<compile_context>
chip_gen: v7x
topology: tpu7x:2x2x1
jax: 0.10.0
libtpu: 0.0.40
codegen_flags: <defaults>
</compile_context>

<pallas_src>
import functools

import jax
import jax.numpy as jnp
from jax import lax
from jax.experimental import pallas as pl
from jax.experimental.pallas import tpu as pltpu


# ---------------------------------------------------------------------------
# Kernel 1: per-tile instance classifier + query projection (parallel over N)
#   classes^T[c, n] = sum_d Wi[d, c] x[n, d] + bi[c]          (f32 -> exact argmax)
#   Q^T[l, n]       = tanh(W2^T relu(W1^T x^T + b1) + b2)     (bf16 MXU, f32 accum)
#   xb              = bf16 copy of the x tile for kernel 2
# ---------------------------------------------------------------------------
def _proj_kernel(x_ref, wi_ref, bic_ref, w1_ref, b1c_ref, w2_ref, b2c_ref,
                 classes_ref, q_ref, xb_ref):
    x = x_ref[...]                                              # (TN, D) f32

    classes_ref[...] = lax.dot_general(
        wi_ref[...], x, (((0,), (1,)), ((), ())),
        preferred_element_type=jnp.float32) + bic_ref[...]      # (C, TN)

    xb = x.astype(jnp.bfloat16)
    xb_ref[...] = xb                                            # (TN, D) bf16

    h1 = lax.dot_general(w1_ref[...], xb, (((0,), (1,)), ((), ())),
                         preferred_element_type=jnp.float32) + b1c_ref[...]
    h1 = jnp.maximum(h1, 0.0).astype(jnp.bfloat16)              # (L, TN)
    h2 = lax.dot_general(w2_ref[...], h1, (((0,), (0,)), ((), ())),
                         preferred_element_type=jnp.float32) + b2c_ref[...]
    q_ref[...] = jnp.tanh(h2).astype(q_ref.dtype)               # (L, TN) bf16


# ---------------------------------------------------------------------------
# Kernel 2: single online-softmax attention sweep over N tiles (grid = (nt,))
#   per tile: scores^T = (Qm/sqrt(L)) @ Q^T  -> running (max, sum, e @ x)
#   outputs : raw scores^T per tile, final (max, sum), B, conv pred
#   (A itself is normalized in the wrapper: A = exp(s - m_final) / l_final.)
# ---------------------------------------------------------------------------
def _attention_kernel(q_ref, xb_ref, qm_ref, wct_ref, bc_ref,
                      s_ref, m_ref, l_ref, b_ref, pred_ref,
                      m_s, l_s, acc_s, *, n_classes, tile_n, n_valid, n_padded):
    j = pl.program_id(0)
    nt = pl.num_programs(0)

    @pl.when(j == 0)
    def _init():
        m_s[...] = jnp.full(m_s.shape, -jnp.inf, m_s.dtype)
        l_s[...] = jnp.zeros(l_s.shape, l_s.dtype)
        acc_s[...] = jnp.zeros(acc_s.shape, acc_s.dtype)

    # scores^T = Qm_scaled @ Q^T, contracting L -> (C, TN); no XLU transposes.
    s = lax.dot_general(qm_ref[...], q_ref[...], (((0,), (0,)), ((), ())),
                        preferred_element_type=jnp.float32)

    if n_valid != n_padded:   # static: mask zero-padded instances
        col = lax.broadcasted_iota(jnp.int32, s.shape, 1) + j * tile_n
        s = jnp.where(col < n_valid, s, -1e30)

    s_ref[...] = s                                              # raw scores^T tile

    m_prev = m_s[...]
    m_new = jnp.maximum(m_prev, jnp.max(s, axis=1, keepdims=True))   # (C, 1)
    alpha = jnp.exp(m_prev - m_new)
    e = jnp.exp(s - m_new)                                           # (C, TN)
    l_s[...] = alpha * l_s[...] + jnp.sum(e, axis=1, keepdims=True)
    acc_s[...] = alpha * acc_s[...] + lax.dot_general(
        e.astype(jnp.bfloat16), xb_ref[...],
        (((1,), (0,)), ((), ())), preferred_element_type=jnp.float32)
    m_s[...] = m_new

    @pl.when(j == nt - 1)
    def _finalize():
        m_ref[...] = m_s[...]
        l_ref[...] = l_s[...]
        inv_l = 1.0 / l_s[...]                                  # exact (C, 1) divide
        bmat = acc_s[...] * inv_l                               # (C, D) bag embedding
        b_ref[...] = bmat
        # Conv1d(C, C, kernel_size=D) == dense contraction over (c_in, d).
        # C is tiny & static -> C static-sliced MXU terms.
        parts = [jnp.dot(bmat[c:c + 1, :], wct_ref[c],
                         preferred_element_type=jnp.float32)
                 for c in range(n_classes)]
        pred_ref[...] = bc_ref[...] + functools.reduce(jnp.add, parts)


# ---------------------------------------------------------------------------
# Wrapper
# ---------------------------------------------------------------------------
def _const_spec(shape):
    zeros = (0,) * len(shape)
    # Constant block index every grid step -> single-buffer to halve weight VMEM.
    return pl.BlockSpec(shape, lambda *_: zeros, pipeline_mode=pl.Buffered(1))


def _pick_tile_n(n, d, l, c, vmem_limit):
    """Largest 128-aligned N-tile whose kernel-1 working set fits the VMEM limit."""
    weight_bytes = (d * c * 4 + d * l * 2 + l * l * 2          # wi, w1, w2
                    + l * c * 2 + c * d * c * 4                # qm^T, conv weight
                    + 4 * (2 * l + 3 * c + c * d))             # biases + scratch
    # kernel-1 double-buffered per-row bytes: x(f32) in + classes^T/Q^T/xb outs
    per_row = 12 * d + 4 * l + 8 * c
    budget = vmem_limit - weight_bytes - (4 << 20)             # headroom
    tn = 1024
    while tn > 128 and tn * per_row > budget:
        tn //= 2
    n_ceil = -(-n // 128) * 128
    while tn > 128 and tn > n_ceil:                            # avoid huge padding
        tn //= 2
    return tn


def milnet_buffer_forward(x, params, *, tile_n=None):
    """BufferMIL forward.  Returns (classes, prediction_bag, A, B)."""
    N, D = x.shape
    C = params["wi"].shape[1]
    L = params["w1"].shape[1]

    try:
        vmem_cap = int(pltpu.get_tpu_info().vmem_capacity_bytes)
    except Exception:
        vmem_cap = 64 << 20                 # conservative (v7x physical VMEM)
    vmem_limit = vmem_cap * 7 // 8

    TN = tile_n if tile_n is not None else _pick_tile_n(N, D, L, C, vmem_limit)
    if TN % 128 != 0:
        raise ValueError("tile_n must be a multiple of 128")
    NP = -(-N // TN) * TN                   # pad bag to a whole number of tiles
    nt = NP // TN

    x32 = x.astype(jnp.float32)
    xp = x32 if NP == N else jnp.pad(x32, ((0, NP - N), (0, 0)))

    wi = params["wi"].astype(jnp.float32)                     # (D, C)
    bic = params["bi"].reshape(C, 1).astype(jnp.float32)      # (C, 1)
    w1f = params["w1"].astype(jnp.float32)                    # (D, L)
    b1f = params["b1"].astype(jnp.float32)                    # (1, L)
    w2f = params["w2"].astype(jnp.float32)                    # (L, L)
    b2f = params["b2"].astype(jnp.float32)                    # (1, L)
    w1b, b1c = w1f.astype(jnp.bfloat16), b1f.reshape(L, 1)
    w2b, b2c = w2f.astype(jnp.bfloat16), b2f.reshape(L, 1)
    wct = params["wct"].astype(jnp.float32)                   # (C, D, C)
    bc = params["bc"].astype(jnp.float32)                     # (1, C)

    # --- kernel 1: classes^T, Q^T, bf16 x; fully parallel over N tiles ---------
    classes_t, q_t, xb = pl.pallas_call(
        _proj_kernel,
        grid=(nt,),
        in_specs=[
            pl.BlockSpec((TN, D), lambda j: (j, 0)),
            _const_spec((D, C)),
            _const_spec((C, 1)),
            _const_spec((D, L)),
            _const_spec((L, 1)),
            _const_spec((L, L)),
            _const_spec((L, 1)),
        ],
        out_specs=(
            pl.BlockSpec((C, TN), lambda j: (0, j)),
            pl.BlockSpec((L, TN), lambda j: (0, j)),
            pl.BlockSpec((TN, D), lambda j: (j, 0)),
        ),
        out_shape=(
            jax.ShapeDtypeStruct((C, NP), jnp.float32),
            jax.ShapeDtypeStruct((L, NP), jnp.bfloat16),
            jax.ShapeDtypeStruct((NP, D), jnp.bfloat16),
        ),
        compiler_params=pltpu.CompilerParams(
            dimension_semantics=("parallel",), vmem_limit_bytes=vmem_limit),
    )(xp, wi, bic, w1b, b1c, w2b, b2c)

    # --- critical instance per class (tiny XLA glue: argmax + C-row gather) -----
    crit_idx = jnp.argmax(classes_t[:, :N], axis=1)           # ties -> lowest index
    m_feats = x32[crit_idx]                                   # (C, D)

    # --- Qm^T (pre-scaled by 1/sqrt(L)): tiny (L, C) tensor computed in XLA so
    #     kernel 2 never pins W1/W2 in VMEM -------------------------------------
    h1 = jnp.maximum(m_feats @ w1f + b1f, 0.0)
    qm = jnp.tanh(h1 @ w2f + b2f)                             # (C, L) f32
    qm_t = (qm.T * (1.0 / float(L) ** 0.5)).astype(jnp.bfloat16)   # (L, C) bf16

    # --- kernel 2: single online-softmax sweep over N tiles --------------------
    # TODO(synk): on v7x the sweep could be split across both TensorCores
    # (core_map + per-core partial (m,l,acc) + tiny combine); single-core here.
    attn_kernel = functools.partial(
        _attention_kernel, n_classes=C, tile_n=TN, n_valid=N, n_padded=NP)

    s_t, m_fin, l_fin, b_mat, pred = pl.pallas_call(
        attn_kernel,
        grid=(nt,),
        in_specs=[
            pl.BlockSpec((L, TN), lambda j: (0, j)),          # Q^T tile (bf16)
            pl.BlockSpec((TN, D), lambda j: (j, 0)),          # x tile (bf16)
            _const_spec((L, C)),                              # Qm^T pre-scaled
            _const_spec((C, D, C)),                           # conv weight
            _const_spec((1, C)),                              # conv bias
        ],
        out_specs=(
            pl.BlockSpec((C, TN), lambda j: (0, j)),          # raw scores^T
            pl.BlockSpec((C, 1), lambda j: (0, 0)),           # final max
            pl.BlockSpec((C, 1), lambda j: (0, 0)),           # final sum
            pl.BlockSpec((C, D), lambda j: (0, 0)),           # B
            pl.BlockSpec((1, C), lambda j: (0, 0)),           # pred
        ),
        out_shape=(
            jax.ShapeDtypeStruct((C, NP), jnp.float32),
            jax.ShapeDtypeStruct((C, 1), jnp.float32),
            jax.ShapeDtypeStruct((C, 1), jnp.float32),
            jax.ShapeDtypeStruct((C, D), jnp.float32),
            jax.ShapeDtypeStruct((1, C), jnp.float32),
        ),
        scratch_shapes=[
            pltpu.VMEM((C, 1), jnp.float32),     # running max m
            pltpu.VMEM((C, 1), jnp.float32),     # running sum l
            pltpu.VMEM((C, D), jnp.float32),     # running unnormalized B
        ],
        compiler_params=pltpu.CompilerParams(
            dimension_semantics=("arbitrary",), vmem_limit_bytes=vmem_limit),
    )(q_t, xb, qm_t, wct, bc)

    # Normalize attention in the wrapper (tiny C*N elementwise op), slice padding,
    # and transpose the lane-dense kernel layouts back to module layout.
    a_t = jnp.exp(s_t - m_fin) / l_fin                        # (C, NP)
    return classes_t[:, :N].T, pred, a_t[:, :N].T, b_mat


# ---------------------------------------------------------------------------
# Pure-JAX reference mirroring the PyTorch semantics
# ---------------------------------------------------------------------------
def _reference_forward(x, p):
    classes = x @ p["wi"] + p["bi"][0]
    m_feats = x[jnp.argmax(classes, axis=0)]

    def q(h):
        h1 = jnp.maximum(h @ p["w1"] + p["b1"][0], 0.0)
        return jnp.tanh(h1 @ p["w2"] + p["b2"][0])

    Q, Qm = q(x), q(m_feats)
    A = jax.nn.softmax((Q @ Qm.T) / jnp.sqrt(jnp.float32(Q.shape[1])), axis=0)
    B = A.T @ x
    pred = jnp.einsum("cd,cdk->k", B, p["wct"])[None, :] + p["bc"]
    return classes, pred, A, B


if __name__ == "__main__":
    # 300 instances (not a multiple of 128 -> exercises the pad+mask path), 128-dim
    # features, 4 classes, query size 128; tile_n=128 -> 3 N-tiles (pipelined,
    # multi-tile online softmax).
    N, D, C, L = 300, 128, 4, 128

    key = jax.random.PRNGKey(0)
    ks = jax.random.split(key, 9)
    params = dict(
        wi=jax.random.normal(ks[0], (D, C), jnp.float32) * 0.1,    # FCLayer linear
        bi=jax.random.normal(ks[1], (1, C), jnp.float32) * 0.01,
        w1=jax.random.normal(ks[2], (D, L), jnp.float32) * 0.1,    # q: Linear(D, L)
        b1=jax.random.normal(ks[3], (1, L), jnp.float32) * 0.01,
        w2=jax.random.normal(ks[4], (L, L), jnp.float32) * 0.1,    # q: Linear(L, L)
        b2=jax.random.normal(ks[5], (1, L), jnp.float32) * 0.01,
        # Conv1d(C, C, kernel_size=D) weight stored as wct[c_in, d, c_out]
        wct=jax.random.normal(ks[6], (C, D, C), jnp.float32) * 0.1,
        bc=jax.random.normal(ks[7], (1, C), jnp.float32) * 0.01,
    )
    x = jax.random.normal(ks[8], (N, D), jnp.float32)

    fwd = jax.jit(functools.partial(milnet_buffer_forward, tile_n=128))
    classes, pred, A, B = jax.block_until_ready(fwd(x, params))

    rc, rp, rA, rB = _reference_forward(x, params)
    assert classes.shape == (N, C) and A.shape == (N, C) and B.shape == (C, D)
    # classes: f32 kernel math (tight); A/B/pred: bf16 MXU operands -> looser.
    assert jnp.allclose(classes, rc, atol=1e-3, rtol=1e-3), "classes mismatch"
    assert jnp.allclose(A, rA, atol=3e-2, rtol=3e-2), "A mismatch"
    assert jnp.allclose(B, rB, atol=3e-2, rtol=3e-2), "B mismatch"
    assert jnp.allclose(pred, rp, atol=3e-2, rtol=3e-2), "pred mismatch"
    # sanity: attention over instances sums to 1 per class (exact normalization)
    assert jnp.allclose(jnp.sum(A, axis=0), jnp.ones((C,)), atol=1e-3), "A not normalized"
    print("KERNEL_OK")
</pallas_src>

<mosaic_0001>
module attributes {stable_mosaic.version = 11 : i64} {
  func.func @_proj_kernel(%arg0: i32, %arg1: memref<128x128xf32, #tpu.memory_space<vmem>>, %arg2: memref<128x4xf32, #tpu.memory_space<vmem>>, %arg3: memref<4x1xf32, #tpu.memory_space<vmem>>, %arg4: memref<128x128xbf16, #tpu.memory_space<vmem>>, %arg5: memref<128x1xf32, #tpu.memory_space<vmem>>, %arg6: memref<128x128xbf16, #tpu.memory_space<vmem>>, %arg7: memref<128x1xf32, #tpu.memory_space<vmem>>, %arg8: memref<4x128xf32, #tpu.memory_space<vmem>>, %arg9: memref<128x128xbf16, #tpu.memory_space<vmem>>, %arg10: memref<128x128xbf16, #tpu.memory_space<vmem>>) attributes {dimension_semantics = [#tpu.dimension_semantics<parallel>], iteration_bounds = array<i64: 3>, scalar_prefetch = 0 : i64, scratch_operands = 0 : i64, tpu.core_type = #tpu.core_type<tc>, window_params = [{transform_indices = @transform_0, window_bounds = array<i64: 128, 128>}, {pipeline_mode = #tpu.pipeline_mode<synchronous>, transform_indices = @transform_1, window_bounds = array<i64: 128, 4>}, {pipeline_mode = #tpu.pipeline_mode<synchronous>, transform_indices = @transform_2, window_bounds = array<i64: 4, 1>}, {pipeline_mode = #tpu.pipeline_mode<synchronous>, transform_indices = @transform_3, window_bounds = array<i64: 128, 128>}, {pipeline_mode = #tpu.pipeline_mode<synchronous>, transform_indices = @transform_4, window_bounds = array<i64: 128, 1>}, {pipeline_mode = #tpu.pipeline_mode<synchronous>, transform_indices = @transform_5, window_bounds = array<i64: 128, 128>}, {pipeline_mode = #tpu.pipeline_mode<synchronous>, transform_indices = @transform_6, window_bounds = array<i64: 128, 1>}, {transform_indices = @transform_7, window_bounds = array<i64: 4, 128>}, {transform_indices = @transform_8, window_bounds = array<i64: 128, 128>}, {transform_indices = @transform_9, window_bounds = array<i64: 128, 128>}]} {
    %c0 = arith.constant 0 : index
    %c0_0 = arith.constant 0 : index
    %0 = vector.load %arg1[%c0, %c0_0] : memref<128x128xf32, #tpu.memory_space<vmem>>, vector<128x128xf32>
    %c0_1 = arith.constant 0 : index
    %c0_2 = arith.constant 0 : index
    %1 = vector.load %arg2[%c0_1, %c0_2] : memref<128x4xf32, #tpu.memory_space<vmem>>, vector<128x4xf32>
    %cst = arith.constant dense<0.000000e+00> : vector<4x128xf32>
    %2 = tpu.matmul %1, %0, %cst {dimension_numbers = #tpu.dot_dimension_numbers<[0], [1], [1], [0], [0, 1, 1, 0], [], []>} : vector<128x4xf32>, vector<128x128xf32>, vector<4x128xf32> -> vector<4x128xf32>
    %c0_3 = arith.constant 0 : index
    %c0_4 = arith.constant 0 : index
    %3 = vector.load %arg3[%c0_3, %c0_4] : memref<4x1xf32, #tpu.memory_space<vmem>>, vector<4x1xf32>
    %4 = vector.broadcast %3 : vector<4x1xf32> to vector<4x128xf32>
    %5 = arith.addf %2, %4 : vector<4x128xf32>
    %c0_5 = arith.constant 0 : index
    %c0_6 = arith.constant 0 : index
    %6 = vector.load %arg8[%c0_5, %c0_6] : memref<4x128xf32, #tpu.memory_space<vmem>>, vector<4x128xf32>
    tpu.vector_store %arg8[%c0_5, %c0_6], %5 {strides = array<i32>} : memref<4x128xf32, #tpu.memory_space<vmem>>, vector<4x128xf32>,
    %7 = arith.truncf %0 : vector<128x128xf32> to vector<128x128xbf16>
    %c0_7 = arith.constant 0 : index
    %c0_8 = arith.constant 0 : index
    %8 = vector.load %arg10[%c0_7, %c0_8] : memref<128x128xbf16, #tpu.memory_space<vmem>>, vector<128x128xbf16>
    tpu.vector_store %arg10[%c0_7, %c0_8], %7 {strides = array<i32>} : memref<128x128xbf16, #tpu.memory_space<vmem>>, vector<128x128xbf16>,
    %c0_9 = arith.constant 0 : index
    %c0_10 = arith.constant 0 : index
    %9 = vector.load %arg4[%c0_9, %c0_10] : memref<128x128xbf16, #tpu.memory_space<vmem>>, vector<128x128xbf16>
    %cst_11 = arith.constant dense<0.000000e+00> : vector<128x128xf32>
    %10 = tpu.matmul %9, %7, %cst_11 {dimension_numbers = #tpu.dot_dimension_numbers<[0], [1], [1], [0], [0, 1, 1, 0], [], []>} : vector<128x128xbf16>, vector<128x128xbf16>, vector<128x128xf32> -> vector<128x128xf32>
    %c0_12 = arith.constant 0 : index
    %c0_13 = arith.constant 0 : index
    %11 = vector.load %arg5[%c0_12, %c0_13] : memref<128x1xf32, #tpu.memory_space<vmem>>, vector<128x1xf32>
    %12 = vector.broadcast %11 : vector<128x1xf32> to vector<128x128xf32>
    %13 = arith.addf %10, %12 : vector<128x128xf32>
    %cst_14 = arith.constant 0.000000e+00 : f32
    %14 = vector.broadcast %cst_14 : f32 to vector<128x128xf32>
    %15 = arith.maximumf %13, %14 : vector<128x128xf32>
    %16 = arith.truncf %15 : vector<128x128xf32> to vector<128x128xbf16>
    %c0_15 = arith.constant 0 : index
    %c0_16 = arith.constant 0 : index
    %17 = vector.load %arg6[%c0_15, %c0_16] : memref<128x128xbf16, #tpu.memory_space<vmem>>, vector<128x128xbf16>
    %cst_17 = arith.constant dense<0.000000e+00> : vector<128x128xf32>
    %18 = tpu.matmul %17, %16, %cst_17 {dimension_numbers = #tpu.dot_dimension_numbers<[0], [0], [1], [1], [0, 1, 1, 1], [], []>} : vector<128x128xbf16>, vector<128x128xbf16>, vector<128x128xf32> -> vector<128x128xf32>
    %c0_18 = arith.constant 0 : index
    %c0_19 = arith.constant 0 : index
    %19 = vector.load %arg7[%c0_18, %c0_19] : memref<128x1xf32, #tpu.memory_space<vmem>>, vector<128x1xf32>
    %20 = vector.broadcast %19 : vector<128x1xf32> to vector<128x128xf32>
    %21 = arith.addf %18, %20 : vector<128x128xf32>
    %22 = math.tanh %21 : vector<128x128xf32>
    %23 = arith.truncf %22 : vector<128x128xf32> to vector<128x128xbf16>
    %c0_20 = arith.constant 0 : index
    %c0_21 = arith.constant 0 : index
    %24 = vector.load %arg9[%c0_20, %c0_21] : memref<128x128xbf16, #tpu.memory_space<vmem>>, vector<128x128xbf16>
    tpu.vector_store %arg9[%c0_20, %c0_21], %23 {strides = array<i32>} : memref<128x128xbf16, #tpu.memory_space<vmem>>, vector<128x128xbf16>,
    return
  }
  func.func @transform_0(%arg0: i32) -> (i32, i32) {
    %c0_i32 = arith.constant 0 : i32
    %c0_i32_0 = arith.constant 0 : i32
    return %arg0, %c0_i32 : i32, i32
  }
  func.func @transform_1(%arg0: i32) -> (i32, i32) {
    %c0_i32 = arith.constant 0 : i32
    %c0_i32_0 = arith.constant 0 : i32
    %c0_i32_1 = arith.constant 0 : i32
    return %c0_i32, %c0_i32_0 : i32, i32
  }
  func.func @transform_2(%arg0: i32) -> (i32, i32) {
    %c0_i32 = arith.constant 0 : i32
    %c0_i32_0 = arith.constant 0 : i32
    %c0_i32_1 = arith.constant 0 : i32
    return %c0_i32, %c0_i32_0 : i32, i32
  }
  func.func @transform_3(%arg0: i32) -> (i32, i32) {
    %c0_i32 = arith.constant 0 : i32
    %c0_i32_0 = arith.constant 0 : i32
    %c0_i32_1 = arith.constant 0 : i32
    return %c0_i32, %c0_i32_0 : i32, i32
  }
  func.func @transform_4(%arg0: i32) -> (i32, i32) {
    %c0_i32 = arith.constant 0 : i32
    %c0_i32_0 = arith.constant 0 : i32
    %c0_i32_1 = arith.constant 0 : i32
    return %c0_i32, %c0_i32_0 : i32, i32
  }
  func.func @transform_5(%arg0: i32) -> (i32, i32) {
    %c0_i32 = arith.constant 0 : i32
    %c0_i32_0 = arith.constant 0 : i32
    %c0_i32_1 = arith.constant 0 : i32
    return %c0_i32, %c0_i32_0 : i32, i32
  }
  func.func @transform_6(%arg0: i32) -> (i32, i32) {
    %c0_i32 = arith.constant 0 : i32
    %c0_i32_0 = arith.constant 0 : i32
    %c0_i32_1 = arith.constant 0 : i32
    return %c0_i32, %c0_i32_0 : i32, i32
  }
  func.func @transform_7(%arg0: i32) -> (i32, i32) {
    %c0_i32 = arith.constant 0 : i32
    %c0_i32_0 = arith.constant 0 : i32
    return %c0_i32, %arg0 : i32, i32
  }
  func.func @transform_8(%arg0: i32) -> (i32, i32) {
    %c0_i32 = arith.constant 0 : i32
    %c0_i32_0 = arith.constant 0 : i32
    return %c0_i32, %arg0 : i32, i32
  }
  func.func @transform_9(%arg0: i32) -> (i32, i32) {
    %c0_i32 = arith.constant 0 : i32
    %c0_i32_0 = arith.constant 0 : i32
    return %arg0, %c0_i32 : i32, i32
  }
}

module attributes {stable_mosaic.version = 11 : i64} {
  func.func @_attention_kernel(%arg0: i32, %arg1: memref<128x128xbf16, #tpu.memory_space<vmem>>, %arg2: memref<128x128xbf16, #tpu.memory_space<vmem>>, %arg3: memref<128x4xbf16, #tpu.memory_space<vmem>>, %arg4: memref<4x128x4xf32, #tpu.memory_space<vmem>>, %arg5: memref<1x4xf32, #tpu.memory_space<vmem>>, %arg6: memref<4x128xf32, #tpu.memory_space<vmem>>, %arg7: memref<4x1xf32, #tpu.memory_space<vmem>>, %arg8: memref<4x1xf32, #tpu.memory_space<vmem>>, %arg9: memref<4x128xf32, #tpu.memory_space<vmem>>, %arg10: memref<1x4xf32, #tpu.memory_space<vmem>>, %arg11: memref<4x1xf32, #tpu.memory_space<vmem>>, %arg12: memref<4x1xf32, #tpu.memory_space<vmem>>, %arg13: memref<4x128xf32, #tpu.memory_space<vmem>>) attributes {dimension_semantics = [#tpu.dimension_semantics<arbitrary>], iteration_bounds = array<i64: 3>, scalar_prefetch = 0 : i64, scratch_operands = 3 : i64, tpu.core_type = #tpu.core_type<tc>, window_params = [{transform_indices = @transform_0, window_bounds = array<i64: 128, 128>}, {transform_indices = @transform_1, window_bounds = array<i64: 128, 128>}, {pipeline_mode = #tpu.pipeline_mode<synchronous>, transform_indices = @transform_2, window_bounds = array<i64: 128, 4>}, {pipeline_mode = #tpu.pipeline_mode<synchronous>, transform_indices = @transform_3, window_bounds = array<i64: 4, 128, 4>}, {pipeline_mode = #tpu.pipeline_mode<synchronous>, transform_indices = @transform_4, window_bounds = array<i64: 1, 4>}, {transform_indices = @transform_5, window_bounds = array<i64: 4, 128>}, {pipeline_mode = #tpu.pipeline_mode<synchronous>, transform_indices = @transform_6, window_bounds = array<i64: 4, 1>}, {pipeline_mode = #tpu.pipeline_mode<synchronous>, transform_indices = @transform_7, window_bounds = array<i64: 4, 1>}, {pipeline_mode = #tpu.pipeline_mode<synchronous>, transform_indices = @transform_8, window_bounds = array<i64: 4, 128>}, {pipeline_mode = #tpu.pipeline_mode<synchronous>, transform_indices = @transform_9, window_bounds = array<i64: 1, 4>}]} {
    %c0_i32 = arith.constant 0 : i32
    %0 = arith.cmpi eq, %arg0, %c0_i32 : i32
    %1 = arith.extui %0 : i1 to i32
    %c0_i32_0 = arith.constant 0 : i32
    %2 = arith.cmpi ne, %1, %c0_i32_0 : i32
    scf.if %2 {
      %cst_25 = arith.constant 0xFF800000 : f32
      %42 = vector.broadcast %cst_25 : f32 to vector<4x1xf32>
      %c0_26 = arith.constant 0 : index
      %c0_27 = arith.constant 0 : index
      %43 = vector.load %arg11[%c0_26, %c0_27] : memref<4x1xf32, #tpu.memory_space<vmem>>, vector<4x1xf32>
      tpu.vector_store %arg11[%c0_26, %c0_27], %42 {strides = array<i32>} : memref<4x1xf32, #tpu.memory_space<vmem>>, vector<4x1xf32>,
      %cst_28 = arith.constant 0.000000e+00 : f32
      %44 = vector.broadcast %cst_28 : f32 to vector<4x1xf32>
      %c0_29 = arith.constant 0 : index
      %c0_30 = arith.constant 0 : index
      %45 = vector.load %arg12[%c0_29, %c0_30] : memref<4x1xf32, #tpu.memory_space<vmem>>, vector<4x1xf32>
      tpu.vector_store %arg12[%c0_29, %c0_30], %44 {strides = array<i32>} : memref<4x1xf32, #tpu.memory_space<vmem>>, vector<4x1xf32>,
      %cst_31 = arith.constant 0.000000e+00 : f32
      %46 = vector.broadcast %cst_31 : f32 to vector<4x128xf32>
      %c0_32 = arith.constant 0 : index
      %c0_33 = arith.constant 0 : index
      %47 = vector.load %arg13[%c0_32, %c0_33] : memref<4x128xf32, #tpu.memory_space<vmem>>, vector<4x128xf32>
      tpu.vector_store %arg13[%c0_32, %c0_33], %46 {strides = array<i32>} : memref<4x128xf32, #tpu.memory_space<vmem>>, vector<4x128xf32>,
    } else {
    }
    %c0 = arith.constant 0 : index
    %c0_1 = arith.constant 0 : index
    %3 = vector.load %arg3[%c0, %c0_1] : memref<128x4xbf16, #tpu.memory_space<vmem>>, vector<128x4xbf16>
    %c0_2 = arith.constant 0 : index
    %c0_3 = arith.constant 0 : index
    %4 = vector.load %arg1[%c0_2, %c0_3] : memref<128x128xbf16, #tpu.memory_space<vmem>>, vector<128x128xbf16>
    %cst = arith.constant dense<0.000000e+00> : vector<4x128xf32>
    %5 = tpu.matmul %3, %4, %cst {dimension_numbers = #tpu.dot_dimension_numbers<[0], [0], [1], [1], [0, 1, 1, 1], [], []>} : vector<128x4xbf16>, vector<128x128xbf16>, vector<4x128xf32> -> vector<4x128xf32>
    %6 = tpu.iota {dimensions = array<i32: 1>} : vector<4x128xi32>
    %c128_i32 = arith.constant 128 : i32
    %7 = arith.muli %arg0, %c128_i32 : i32
    %8 = vector.broadcast %7 : i32 to vector<4x128xi32>
    %9 = arith.addi %6, %8 : vector<4x128xi32>
    %c300_i32 = arith.constant 300 : i32
    %10 = vector.broadcast %c300_i32 : i32 to vector<4x128xi32>
    %11 = arith.cmpi slt, %9, %10 : vector<4x128xi32>
    %cst_4 = arith.constant -1.000000e+30 : f32
    %12 = vector.broadcast %cst_4 : f32 to vector<4x128xf32>
    %13 = arith.select %11, %5, %12 : vector<4x128xi1>, vector<4x128xf32>
    %c0_5 = arith.constant 0 : index
    %c0_6 = arith.constant 0 : index
    %14 = vector.load %arg6[%c0_5, %c0_6] : memref<4x128xf32, #tpu.memory_space<vmem>>, vector<4x128xf32>
    tpu.vector_store %arg6[%c0_5, %c0_6], %13 {strides = array<i32>} : memref<4x128xf32, #tpu.memory_space<vmem>>, vector<4x128xf32>,
    %c0_7 = arith.constant 0 : index
    %c0_8 = arith.constant 0 : index
    %15 = vector.load %arg11[%c0_7, %c0_8] : memref<4x1xf32, #tpu.memory_space<vmem>>, vector<4x1xf32>
    %cst_9 = arith.constant dense<0xFF800000> : vector<4xf32>
    %16 = vector.multi_reduction <maximumf>, %13, %cst_9 [1] : vector<4x128xf32> to vector<4xf32>
    %17 = vector.shape_cast %16 : vector<4xf32> to vector<4x1xf32>
    %18 = arith.maximumf %15, %17 : vector<4x1xf32>
    %19 = arith.subf %15, %18 : vector<4x1xf32>
    %20 = math.exp %19 : vector<4x1xf32>
    %21 = vector.broadcast %18 : vector<4x1xf32> to vector<4x128xf32>
    %22 = arith.subf %13, %21 : vector<4x128xf32>
    %23 = math.exp %22 : vector<4x128xf32>
    %c0_10 = arith.constant 0 : index
    %c0_11 = arith.constant 0 : index
    %24 = vector.load %arg12[%c0_10, %c0_11] : memref<4x1xf32, #tpu.memory_space<vmem>>, vector<4x1xf32>
    %25 = arith.mulf %20, %24 : vector<4x1xf32>
    %cst_12 = arith.constant dense<0.000000e+00> : vector<4xf32>
    %26 = vector.multi_reduction <add>, %23, %cst_12 [1] : vector<4x128xf32> to vector<4xf32>
    %27 = vector.shape_cast %26 : vector<4xf32> to vector<4x1xf32>
    %28 = arith.addf %25, %27 : vector<4x1xf32>
    %c0_13 = arith.constant 0 : index
    %c0_14 = arith.constant 0 : index
    %29 = vector.load %arg12[%c0_13, %c0_14] : memref<4x1xf32, #tpu.memory_space<vmem>>, vector<4x1xf32>
    tpu.vector_store %arg12[%c0_13, %c0_14], %28 {strides = array<i32>} : memref<4x1xf32, #tpu.memory_space<vmem>>, vector<4x1xf32>,
    %c0_15 = arith.constant 0 : index
    %c0_16 = arith.constant 0 : index
    %30 = vector.load %arg13[%c0_15, %c0_16] : memref<4x128xf32, #tpu.memory_space<vmem>>, vector<4x128xf32>
    %31 = vector.broadcast %20 : vector<4x1xf32> to vector<4x128xf32>
    %32 = arith.mulf %31, %30 : vector<4x128xf32>
    %33 = arith.truncf %23 : vector<4x128xf32> to vector<4x128xbf16>
    %c0_17 = arith.constant 0 : index
    %c0_18 = arith.constant 0 : index
    %34 = vector.load %arg2[%c0_17, %c0_18] : memref<128x128xbf16, #tpu.memory_space<vmem>>, vector<128x128xbf16>
    %cst_19 = arith.constant dense<0.000000e+00> : vector<4x128xf32>
    %35 = tpu.matmul %33, %34, %cst_19 {dimension_numbers = #tpu.dot_dimension_numbers<[1], [0], [0], [1], [0, 0, 1, 1], [], []>} : vector<4x128xbf16>, vector<128x128xbf16>, vector<4x128xf32> -> vector<4x128xf32>
    %36 = arith.addf %32, %35 : vector<4x128xf32>
    %c0_20 = arith.constant 0 : index
    %c0_21 = arith.constant 0 : index
    %37 = vector.load %arg13[%c0_20, %c0_21] : memref<4x128xf32, #tpu.memory_space<vmem>>, vector<4x128xf32>
    tpu.vector_store %arg13[%c0_20, %c0_21], %36 {strides = array<i32>} : memref<4x128xf32, #tpu.memory_space<vmem>>, vector<4x128xf32>,
    %c0_22 = arith.constant 0 : index
    %c0_23 = arith.constant 0 : index
    %38 = vector.load %arg11[%c0_22, %c0_23] : memref<4x1xf32, #tpu.memory_space<vmem>>, vector<4x1xf32>
    tpu.vector_store %arg11[%c0_22, %c0_23], %18 {strides = array<i32>} : memref<4x1xf32, #tpu.memory_space<vmem>>, vector<4x1xf32>,
    %c2_i32 = arith.constant 2 : i32
    %39 = arith.cmpi eq, %arg0, %c2_i32 : i32
    %40 = arith.extui %39 : i1 to i32
    %c0_i32_24 = arith.constant 0 : i32
    %41 = arith.cmpi ne, %40, %c0_i32_24 : i32
    scf.if %41 {
      %c0_25 = arith.constant 0 : index
      %c0_26 = arith.constant 0 : index
      %42 = vector.load %arg11[%c0_25, %c0_26] : memref<4x1xf32, #tpu.memory_space<vmem>>, vector<4x1xf32>
      %c0_27 = arith.constant 0 : index
      %c0_28 = arith.constant 0 : index
      %43 = vector.load %arg7[%c0_27, %c0_28] : memref<4x1xf32, #tpu.memory_space<vmem>>, vector<4x1xf32>
      tpu.vector_store %arg7[%c0_27, %c0_28], %42 {strides = array<i32>} : memref<4x1xf32, #tpu.memory_space<vmem>>, vector<4x1xf32>,
      %c0_29 = arith.constant 0 : index
      %c0_30 = arith.constant 0 : index
      %44 = vector.load %arg12[%c0_29, %c0_30] : memref<4x1xf32, #tpu.memory_space<vmem>>, vector<4x1xf32>
      %c0_31 = arith.constant 0 : index
      %c0_32 = arith.constant 0 : index
      %45 = vector.load %arg8[%c0_31, %c0_32] : memref<4x1xf32, #tpu.memory_space<vmem>>, vector<4x1xf32>
      tpu.vector_store %arg8[%c0_31, %c0_32], %44 {strides = array<i32>} : memref<4x1xf32, #tpu.memory_space<vmem>>, vector<4x1xf32>,
      %c0_33 = arith.constant 0 : index
      %c0_34 = arith.constant 0 : index
      %46 = vector.load %arg12[%c0_33, %c0_34] : memref<4x1xf32, #tpu.memory_space<vmem>>, vector<4x1xf32>
      %cst_35 = arith.constant 1.000000e+00 : f32
      %47 = vector.broadcast %cst_35 : f32 to vector<4x1xf32>
      %48 = arith.divf %47, %46 : vector<4x1xf32>
      %c0_36 = arith.constant 0 : index
      %c0_37 = arith.constant 0 : index
      %49 = vector.load %arg13[%c0_36, %c0_37] : memref<4x128xf32, #tpu.memory_space<vmem>>, vector<4x128xf32>
      %50 = vector.broadcast %48 : vector<4x1xf32> to vector<4x128xf32>
      %51 = arith.mulf %49, %50 : vector<4x128xf32>
      %c0_38 = arith.constant 0 : index
      %c0_39 = arith.constant 0 : index
      %52 = vector.load %arg9[%c0_38, %c0_39] : memref<4x128xf32, #tpu.memory_space<vmem>>, vector<4x128xf32>
      tpu.vector_store %arg9[%c0_38, %c0_39], %51 {strides = array<i32>} : memref<4x128xf32, #tpu.memory_space<vmem>>, vector<4x128xf32>,
      %53 = vector.extract_strided_slice %51 {offsets = [0, 0], sizes = [1, 128], strides = [1, 1]} : vector<4x128xf32> to vector<1x128xf32>
      %c0_40 = arith.constant 0 : index
      %c0_41 = arith.constant 0 : index
      %c0_42 = arith.constant 0 : index
      %54 = vector.load %arg4[%c0_40, %c0_41, %c0_42] : memref<4x128x4xf32, #tpu.memory_space<vmem>>, vector<1x128x4xf32>
      %55 = vector.shape_cast %54 : vector<1x128x4xf32> to vector<128x4xf32>
      %cst_43 = arith.constant dense<0.000000e+00> : vector<1x4xf32>
      %56 = tpu.matmul %53, %55, %cst_43 {dimension_numbers = #tpu.dot_dimension_numbers<[1], [0], [0], [1], [0, 0, 1, 1], [], []>} : vector<1x128xf32>, vector<128x4xf32>, vector<1x4xf32> -> vector<1x4xf32>
      %57 = vector.extract_strided_slice %51 {offsets = [1, 0], sizes = [1, 128], strides = [1, 1]} : vector<4x128xf32> to vector<1x128xf32>
      %c1 = arith.constant 1 : index
      %c0_44 = arith.constant 0 : index
      %c0_45 = arith.constant 0 : index
      %58 = vector.load %arg4[%c1, %c0_44, %c0_45] : memref<4x128x4xf32, #tpu.memory_space<vmem>>, vector<1x128x4xf32>
      %59 = vector.shape_cast %58 : vector<1x128x4xf32> to vector<128x4xf32>
      %cst_46 = arith.constant dense<0.000000e+00> : vector<1x4xf32>
      %60 = tpu.matmul %57, %59, %cst_46 {dimension_numbers = #tpu.dot_dimension_numbers<[1], [0], [0], [1], [0, 0, 1, 1], [], []>} : vector<1x128xf32>, vector<128x4xf32>, vector<1x4xf32> -> vector<1x4xf32>
      %61 = vector.extract_strided_slice %51 {offsets = [2, 0], sizes = [1, 128], strides = [1, 1]} : vector<4x128xf32> to vector<1x128xf32>
      %c2 = arith.constant 2 : index
      %c0_47 = arith.constant 0 : index
      %c0_48 = arith.constant 0 : index
      %62 = vector.load %arg4[%c2, %c0_47, %c0_48] : memref<4x128x4xf32, #tpu.memory_space<vmem>>, vector<1x128x4xf32>
      %63 = vector.shape_cast %62 : vector<1x128x4xf32> to vector<128x4xf32>
      %cst_49 = arith.constant dense<0.000000e+00> : vector<1x4xf32>
      %64 = tpu.matmul %61, %63, %cst_49 {dimension_numbers = #tpu.dot_dimension_numbers<[1], [0], [0], [1], [0, 0, 1, 1], [], []>} : vector<1x128xf32>, vector<128x4xf32>, vector<1x4xf32> -> vector<1x4xf32>
      %65 = vector.extract_strided_slice %51 {offsets = [3, 0], sizes = [1, 128], strides = [1, 1]} : vector<4x128xf32> to vector<1x128xf32>
      %c3 = arith.constant 3 : index
      %c0_50 = arith.constant 0 : index
      %c0_51 = arith.constant 0 : index
      %66 = vector.load %arg4[%c3, %c0_50, %c0_51] : memref<4x128x4xf32, #tpu.memory_space<vmem>>, vector<1x128x4xf32>
      %67 = vector.shape_cast %66 : vector<1x128x4xf32> to vector<128x4xf32>
      %cst_52 = arith.constant dense<0.000000e+00> : vector<1x4xf32>
      %68 = tpu.matmul %65, %67, %cst_52 {dimension_numbers = #tpu.dot_dimension_numbers<[1], [0], [0], [1], [0, 0, 1, 1], [], []>} : vector<1x128xf32>, vector<128x4xf32>, vector<1x4xf32> -> vector<1x4xf32>
      %c0_53 = arith.constant 0 : index
      %c0_54 = arith.constant 0 : index
      %69 = vector.load %arg5[%c0_53, %c0_54] : memref<1x4xf32, #tpu.memory_space<vmem>>, vector<1x4xf32>
      %70 = arith.addf %56, %60 : vector<1x4xf32>
      %71 = arith.addf %70, %64 : vector<1x4xf32>
      %72 = arith.addf %71, %68 : vector<1x4xf32>
      %73 = arith.addf %69, %72 : vector<1x4xf32>
      %c0_55 = arith.constant 0 : index
      %c0_56 = arith.constant 0 : index
      %74 = vector.load %arg10[%c0_55, %c0_56] : memref<1x4xf32, #tpu.memory_space<vmem>>, vector<1x4xf32>
      tpu.vector_store %arg10[%c0_55, %c0_56], %73 {strides = array<i32>} : memref<1x4xf32, #tpu.memory_space<vmem>>, vector<1x4xf32>,
    } else {
    }
    return
  }
  func.func @transform_0(%arg0: i32) -> (i32, i32) {
    %c0_i32 = arith.constant 0 : i32
    %c0_i32_0 = arith.constant 0 : i32
    return %c0_i32, %arg0 : i32, i32
  }
  func.func @transform_1(%arg0: i32) -> (i32, i32) {
    %c0_i32 = arith.constant 0 : i32
    %c0_i32_0 = arith.constant 0 : i32
    return %arg0, %c0_i32 : i32, i32
  }
  func.func @transform_2(%arg0: i32) -> (i32, i32) {
    %c0_i32 = arith.constant 0 : i32
    %c0_i32_0 = arith.constant 0 : i32
    %c0_i32_1 = arith.constant 0 : i32
    return %c0_i32, %c0_i32_0 : i32, i32
  }
  func.func @transform_3(%arg0: i32) -> (i32, i32, i32) {
    %c0_i32 = arith.constant 0 : i32
    %c0_i32_0 = arith.constant 0 : i32
    %c0_i32_1 = arith.constant 0 : i32
    %c0_i32_2 = arith.constant 0 : i32
    return %c0_i32, %c0_i32_0, %c0_i32_1 : i32, i32, i32
  }
  func.func @transform_4(%arg0: i32) -> (i32, i32) {
    %c0_i32 = arith.constant 0 : i32
    %c0_i32_0 = arith.constant 0 : i32
    %c0_i32_1 = arith.constant 0 : i32
    return %c0_i32, %c0_i32_0 : i32, i32
  }
  func.func @transform_5(%arg0: i32) -> (i32, i32) {
    %c0_i32 = arith.constant 0 : i32
    %c0_i32_0 = arith.constant 0 : i32
    return %c0_i32, %arg0 : i32, i32
  }
  func.func @transform_6(%arg0: i32) -> (i32, i32) {
    %c0_i32 = arith.constant 0 : i32
    %c0_i32_0 = arith.constant 0 : i32
    %c0_i32_1 = arith.constant 0 : i32
    return %c0_i32, %c0_i32_0 : i32, i32
  }
  func.func @transform_7(%arg0: i32) -> (i32, i32) {
    %c0_i32 = arith.constant 0 : i32
    %c0_i32_0 = arith.constant 0 : i32
    %c0_i32_1 = arith.constant 0 : i32
    return %c0_i32, %c0_i32_0 : i32, i32
  }
  func.func @transform_8(%arg0: i32) -> (i32, i32) {
    %c0_i32 = arith.constant 0 : i32
    %c0_i32_0 = arith.constant 0 : i32
    %c0_i32_1 = arith.constant 0 : i32
    return %c0_i32, %c0_i32_0 : i32, i32
  }
  func.func @transform_9(%arg0: i32) -> (i32, i32) {
    %c0_i32 = arith.constant 0 : i32
    %c0_i32_0 = arith.constant 0 : i32
    %c0_i32_1 = arith.constant 0 : i32
    return %c0_i32, %c0_i32_0 : i32, i32
  }
}

</mosaic_0001>

<bundles_post_ra>
// kernel: milnet_buffer_forward.2
= control target key start
LH: loop header
LB: loop body
LE: loop exit
PB: predicated region body
PF: predicated region fallthrough
CT: control target
= control target key end

     0   :  { %s1997_s30 = smov 0   ;;  %s1999_s10 = smov 0   ;;  %s2341_s0 = inlined_call_operand.vmem [shape: f32[384,128], index: 0, kind: input, shape index: {}]   ;;  %s2342_s1 = inlined_call_operand.vmem [shape: f32[128,4], index: 1, kind: input, shape index: {}]   ;;  %s2343_s2 = inlined_call_operand.vmem [shape: f32[4,1], index: 2, kind: input, shape index: {}]   ;;  %s2344_s3 = inlined_call_operand.vmem [shape: bf16[128,128], index: 3, kind: input, shape index: {}]   ;;  %s2345_s4 = inlined_call_operand.vmem [shape: f32[128,1], index: 4, kind: input, shape index: {}]   ;;  %s2346_s5 = inlined_call_operand.vmem [shape: bf16[128,128], index: 5, kind: input, shape index: {}]   ;;  %s2347_s6 = inlined_call_operand.vmem [shape: f32[128,1], index: 6, kind: input, shape index: {}]   ;;  %s2348_s7 = inlined_call_operand.vmem [shape: f32[4,384], index: 7, kind: output, shape index: {0}]   ;;  %s2349_s8 = inlined_call_operand.vmem [shape: bf16[128,384], index: 8, kind: output, shape index: {1}]   ;;  %s2350_s9 = inlined_call_operand.vmem [shape: bf16[384,128], index: 9, kind: output, shape index: {2}]  }
   0x1   :  { %s2001_s11 = smov 0  }
   0x2 LB: > { %s2010_s12 = sadd.s32 4294967295, %s1941_s11   ;;  %s2012_s13 = sadd.s32 1, %s1941_s11   ;;  %s1941_s11 = sphi %s2001_s11, %s2354_s11   ;;  %s1937_s10 = sphi %s1999_s10, %s2353_s10   ;;  %s1933_s30 = sphi %s1997_s30, %s2352_s30  }
   0x3   : > { %s202_s14 = ssub.s32 %s1941_s11, %s2012_s13  ;;  %s205_s15 = sadd.s32 1, %s1937_s10 }
   0x4   : > { %p203_p0 = scmp.eq.s32.totalorder %s202_s14, 0  ;;  %p215_p1 = scmp.ne.s32.totalorder %s1937_s10, %s1933_s30 }
   0x5   : > { %p216_p2 = scmp.eq.s32.totalorder %s2010_s12, 2  ;;  %p1468_p3 = scmp.ge.s32.totalorder %s1941_s11, 1 }
   0x6   : > { %s2020_s16 = scalar_select %p203_p0, %s1937_s10, %s205_s15  }
   0x7   : > { %p2022_p4 = por %p216_p2, %p215_p1  ;;  %p293_p5 = scmp.lt.s32.totalorder %s1941_s11, 4 }
   0x9   : > { %p294_p6 = pnand %p1468_p3, %p293_p5 }
   0xa   : > { %v591_v0 = vld [vmem:[%s2345_s4] sm:$0xff] (!%p294_p6)  ;;  %v1943_v1 = vmov (!%p294_p6), 0   ;;  %s1470_s22 = sshll.u32 (!%p294_p6), %s2010_s12, 4  ;;  %v592_v3 = vld [vmem:[%s2345_s4 + $0x8] sm:$0xff] (!%p294_p6)  ;;  %v593_v5 = vld [vmem:[%s2345_s4 + $0x10] sm:$0xff] (!%p294_p6)  ;;  %v1944_v17 = vmov (!%p294_p6), 0.0|0.0  }
   0xb   : > { %297 = sbr.rel (%p294_p6) target bundleno = 624 (0x270), region = 48  ;;  %1869 = vset.pattern.permute.xlu1 (!%p294_p6), %v1943_v1  ;;  %v1871_v2 = vld [vmem:[%s2344_s3] sm:$0xff] (!%p294_p6)   ;;  %p338_p7 = scmp.lt.s32.totalorder (!%p294_p6), %s1470_s22, 47  ;;  %v1872_v4 = vld [vmem:[%s2344_s3 + $0x8] sm:$0xff] (!%p294_p6)   ;;  %v1873_v6 = vld [vmem:[%s2344_s3 + $0x10] sm:$0xff] (!%p294_p6)   ;;  %1801 = vmatprep.subr.bf16.mxu0 (!%p294_p6), %v1944_v17  ;;  %vm1945_vm0 = vmmov (!%p294_p6), 0  }
   0xc   : > { %609 = vperm.xlu1 (!%p294_p6), %1869, %v591_v0   ;;  %735 = vxpose.xlu0.c.b16.start [1/8] (!%p294_p6), %v1871_v2, 128  ;;  %v594_v7 = vld [vmem:[%s2345_s4 + $0x18] sm:$0xff] (!%p294_p6)  ;;  %v595_v10 = vld [vmem:[%s2345_s4 + $0x20] sm:$0xff] (!%p294_p6)  ;;  %v596_v27 = vld [vmem:[%s2345_s4 + $0x28] sm:$0xff] (!%p294_p6)  ;;  %v1946_v50 = vmov (!%p294_p6), 0.0   ;;  %p343_p8 = scmp.lt.s32.totalorder (!%p294_p6), %s2010_s12, 2 }
   0xd   : > { %v1874_v8 = vld [vmem:[%s2344_s3 + $0x18] sm:$0xff] (!%p294_p6)   ;;  %v1875_v11 = vld [vmem:[%s2344_s3 + $0x20] sm:$0xff] (!%p294_p6)   ;;  %v1876_v30 = vld [vmem:[%s2344_s3 + $0x28] sm:$0xff] (!%p294_p6)   ;;  %1734 = vmatprep.mubr.msk.f32.mxu0 (!%p294_p6), %vm1945_vm0, %v1946_v50 }
   0xe   : > { %v597_v34 = vld [vmem:[%s2345_s4 + $0x30] sm:$0xff] (!%p294_p6)  ;;  %v598_v39 = vld [vmem:[%s2345_s4 + $0x38] sm:$0xff] (!%p294_p6)  ;;  %v600_v42 = vld [vmem:[%s2345_s4 + $0x48] sm:$0xff] (!%p294_p6) }
   0xf   : > { %v1877_v35 = vld [vmem:[%s2344_s3 + $0x30] sm:$0xff] (!%p294_p6)   ;;  %v1878_v41 = vld [vmem:[%s2344_s3 + $0x38] sm:$0xff] (!%p294_p6)   ;;  %v599_v44 = vld [vmem:[%s2345_s4 + $0x40] sm:$0xff] (!%p294_p6) }
  0x10   : > { %614 = vperm.xlu1 (!%p294_p6), %1869, %v592_v3   ;;  %736 = vxpose.xlu0.c.b16.cont [2/8] (!%p294_p6), %v1872_v4, 128  ;;  %v601_v43 = vld [vmem:[%s2345_s4 + $0x50] sm:$0xff] (!%p294_p6)  ;;  %v602_v45 = vld [vmem:[%s2345_s4 + $0x58] sm:$0xff] (!%p294_p6)  ;;  %v603_v46 = vld [vmem:[%s2345_s4 + $0x60] sm:$0xff] (!%p294_p6) }
  0x11   : > { %v604_v47 = vld [vmem:[%s2345_s4 + $0x68] sm:$0xff] (!%p294_p6)  ;;  %v605_v48 = vld [vmem:[%s2345_s4 + $0x70] sm:$0xff] (!%p294_p6)  ;;  %v606_v49 = vld [vmem:[%s2345_s4 + $0x78] sm:$0xff] (!%p294_p6) }
  0x12   : > { %s2356_s22 = smov (!%p338_p7, %s1470_s22), 47  ;;  %v370_v51 = vld [vmem:[%s2342_s1] sm:$0xff]  ;;  %v371_v52 = vld [vmem:[%s2342_s1 + $0x8] sm:$0xff]  ;;  %v372_v54 = vld [vmem:[%s2342_s1 + $0x10] sm:$0xff]  ;;  %s1524_s11 = sshll.u32 (%p2022_p4), %s2010_s12, 2 }
  0x13   : > { %s1471_s29 = sshll.u32 %s2356_s22, 3  ;;  %s1474_s20 = sshll.u32 %s2356_s22, 2  ;;  %v1879_v53 = vld [vmem:[%s2346_s5] sm:$0xff]   ;;  %v1880_v55 = vld [vmem:[%s2346_s5 + $0x8] sm:$0xff]   ;;  %v373_v56 = vld [vmem:[%s2342_s1 + $0x18] sm:$0xff] }
  0x14   : > { %s2049_s19 = scalar_lea.vmem %s2341_s0, %s1471_s29  ;;  %619 = vperm.xlu1 %1869, %v593_v5   ;;  %737 = vxpose.xlu0.c.b16.cont [3/8] %v1873_v6, 128  ;;  %s2067_s14 = scalar_lea.vmem %s2350_s9, %s1474_s20  ;;  %v1881_v57 = vld [vmem:[%s2346_s5 + $0x10] sm:$0xff]   ;;  %v374_v58 = vld [vmem:[%s2342_s1 + $0x20] sm:$0xff]  ;;  %v1882_v59 = vld [vmem:[%s2346_s5 + $0x18] sm:$0xff]  }
  0x15   : > { %v354_v9 = vld [vmem:[%s2049_s19] sm:$0xff]  ;;  %v355_v12 = vld [vmem:[%s2049_s19 + $0x8] sm:$0xff]  ;;  %v356_v14 = vld [vmem:[%s2049_s19 + $0x10] sm:$0xff]  ;;  %s344_s24 = scalar_select %p343_p8, %s2010_s12, 2 }
  0x16   : > { %v1802_v13 = vpack.c.bf16 %v355_v12, %v354_v9  ;;  %v357_v15 = vld [vmem:[%s2049_s19 + $0x18] sm:$0xff]  ;;  %v358_v16 = vld [vmem:[%s2049_s19 + $0x20] sm:$0xff]  ;;  %v359_v19 = vld [vmem:[%s2049_s19 + $0x28] sm:$0xff]  ;;  %s327_s29 = sand.u32 1, %s1933_s30   ;;  %s1261_s18 = scalar_lea.vmem (%p2022_p4), %s2349_s8, %s1524_s11 }
  0x17   : > { %v1805_v18 = vpack.c.bf16 %v357_v15, %v356_v14  ;;  %v360_v20 = vld [vmem:[%s2049_s19 + $0x30] sm:$0xff]  ;;  %v361_v21 = vld [vmem:[%s2049_s19 + $0x38] sm:$0xff]  ;;  %v1808_v22 = vpack.c.bf16 %v359_v19, %v358_v16  ;;  %v362_v24 = vld [vmem:[%s2049_s19 + $0x40] sm:$0xff]  ;;  %s1472_s25 = sshll.u32 %s344_s24, 2  ;;  %s1469_s22 = sshll.u32 %s327_s29, 6 }
  0x18   : > { %624 = vperm.xlu1 %1869, %v594_v7   ;;  %738 = vxpose.xlu0.c.b16.cont [4/8] %v1874_v8, 128  ;;  %1563 = vst [vmem:[%s2067_s14] sm:$0xff] %v1802_v13   ;;  %v1811_v23 = vpack.c.bf16 %v361_v21, %v360_v20  ;;  %v363_v25 = vld [vmem:[%s2049_s19 + $0x48] sm:$0xff]  ;;  %v364_v28 = vld [vmem:[%s2049_s19 + $0x50] sm:$0xff]  ;;  %v365_v29 = vld [vmem:[%s2049_s19 + $0x58] sm:$0xff]  ;;  %s346_s28 = scalar_lea.vmem %s2348_s7, %s1472_s25  ;;  %s2299_s30 = scalar_lea.vmem [#allocation2], %s1469_s22 }
  0x19   : > { %1737 = vmatprep.subr.bf16.mxu1 %v1802_v13  ;;  %1803 = vmatpush3.bf16.xpose.msra.mxu0 %v1802_v13  ;;  %1639 = vst [vmem:[%s2067_s14 + $0x8] sm:$0xff] %v1805_v18   ;;  %v1814_v26 = vpack.c.bf16 %v363_v25, %v362_v24  ;;  %1640 = vst [vmem:[%s2067_s14 + $0x10] sm:$0xff] %v1808_v22   ;;  %v1817_v31 = vpack.c.bf16 %v365_v29, %v364_v28  ;;  %v366_v32 = vld [vmem:[%s2049_s19 + $0x60] sm:$0xff]  ;;  %v367_v33 = vld [vmem:[%s2049_s19 + $0x68] sm:$0xff] }
  0x1a   : > { %1738 = vmatpush3.bf16.xpose.msra.mxu1 %v1802_v13  ;;  %1804 = vmatprep.subr.bf16.mxu0 %v1944_v17  ;;  %1641 = vst [vmem:[%s2067_s14 + $0x18] sm:$0xff] %v1811_v23   ;;  %v1820_v36 = vpack.c.bf16 %v367_v33, %v366_v32  ;;  %v368_v37 = vld [vmem:[%s2049_s19 + $0x70] sm:$0xff]  ;;  %v369_v38 = vld [vmem:[%s2049_s19 + $0x78] sm:$0xff]  ;;  %v375_v60 = vld [vmem:[%s2342_s1 + $0x28] sm:$0xff] }
  0x1b   : > { %1739 = vmatprep.subr.bf16.mxu1 %v1805_v18  ;;  %1642 = vst [vmem:[%s2067_s14 + $0x20] sm:$0xff] %v1814_v26   ;;  %1643 = vst [vmem:[%s2067_s14 + $0x28] sm:$0xff] %v1817_v31   ;;  %v1823_v40 = vpack.c.bf16 %v369_v38, %v368_v37  ;;  %v1883_v61 = vld [vmem:[%s2346_s5 + $0x20] sm:$0xff]   ;;  %v376_v62 = vld [vmem:[%s2342_s1 + $0x30] sm:$0xff] }
  0x1c   : > { %629 = vperm.xlu1 %1869, %v595_v10   ;;  %739 = vxpose.xlu0.c.b16.cont [5/8] %v1875_v11, 128  ;;  %1644 = vst [vmem:[%s2067_s14 + $0x30] sm:$0xff] %v1820_v36   ;;  %v1884_v63 = vld [vmem:[%s2346_s5 + $0x28] sm:$0xff]   ;;  %v377_v0 = vld [vmem:[%s2342_s1 + $0x38] sm:$0xff]  ;;  %v1885_v2 = vld [vmem:[%s2346_s5 + $0x30] sm:$0xff]  }
  0x1d   : > { %1645 = vst [vmem:[%s2067_s14 + $0x38] sm:$0xff] %v1823_v40   ;;  %v378_v3 = vld [vmem:[%s2342_s1 + $0x40] sm:$0xff]  ;;  %v1886_v5 = vld [vmem:[%s2346_s5 + $0x38] sm:$0xff]   ;;  %v379_v6 = vld [vmem:[%s2342_s1 + $0x48] sm:$0xff] }
  0x1e   : > { %v386_v8 = vld [vmem:[%s2343_s2] sm:$0xf]  ;;  %v380_v9 = vld [vmem:[%s2342_s1 + $0x50] sm:$0xff]  ;;  %v381_v12 = vld [vmem:[%s2342_s1 + $0x58] sm:$0xff] }
  0x1f   : > { %v888_v11 = vld [vmem:[%s2347_s6] sm:$0xff]  ;;  %v889_v14 = vld [vmem:[%s2347_s6 + $0x8] sm:$0xff]  ;;  %v891_v21 = vld [vmem:[%s2347_s6 + $0x18] sm:$0xff] }
  0x20   : > { %634 = vperm.xlu1 %1869, %v596_v27   ;;  %740 = vxpose.xlu0.c.b16.cont [6/8] %v1876_v30, 128  ;;  %v382_v15 = vld [vmem:[%s2342_s1 + $0x60] sm:$0xff]  ;;  %v894_v28 = vld [vmem:[%s2347_s6 + $0x30] sm:$0xff]  ;;  %v895_v30 = vld [vmem:[%s2347_s6 + $0x38] sm:$0xff] }
  0x21   : > { %1806 = vmatpush3.bf16.xpose.msra.mxu0 %v1805_v18  ;;  %v892_v25 = vld [vmem:[%s2347_s6 + $0x20] sm:$0xff]  ;;  %v899_v38 = vld [vmem:[%s2347_s6 + $0x58] sm:$0xff] }
  0x22   : > { %1740 = vmatpush3.bf16.xpose.msra.mxu1 %v1805_v18  ;;  %1807 = vmatprep.subr.bf16.mxu0 %v1944_v17  ;;  %v383_v18 = vld [vmem:[%s2342_s1 + $0x68] sm:$0xff]  ;;  %v896_v32 = vld [vmem:[%s2347_s6 + $0x40] sm:$0xff] }
  0x23   : > { %1741 = vmatprep.subr.bf16.mxu1 %v1808_v22 }
  0x24   : > { %639 = vperm.xlu1 %1869, %v597_v34   ;;  %741 = vxpose.xlu0.c.b16.cont [7/8] %v1877_v35, 128  ;;  %v897_v34 = vld [vmem:[%s2347_s6 + $0x48] sm:$0xff] }
  0x28   : > { %644 = vperm.xlu1 %1869, %v598_v39   ;;  %742 = vxpose.xlu0.c.b16.end [8/8] %v1878_v41, 128 }
  0x29   : > { %1809 = vmatpush3.bf16.xpose.msra.mxu0 %v1808_v22 }
  0x2a   : > { %1742 = vmatpush3.bf16.xpose.msra.mxu1 %v1808_v22  ;;  %1810 = vmatprep.subr.bf16.mxu0 %v1944_v17  ;;  %v384_v22 = vld [vmem:[%s2342_s1 + $0x70] sm:$0xff] }
  0x2b   : > { %1743 = vmatprep.subr.bf16.mxu1 %v1811_v23 }
  0x2c   : > { %654 = vperm.xlu1 %1869, %v600_v42   ;;  %v901_v42 = vld [vmem:[%s2347_s6 + $0x68] sm:$0xff] }
  0x30   : > { %659 = vperm.xlu1 %1869, %v601_v43  }
  0x31   : > { %1870 = vset.pattern.permute.xlu0 %v1943_v1  ;;  %1812 = vmatpush3.bf16.xpose.msra.mxu0 %v1811_v23 }
  0x32   : > { %649 = vperm.xlu0 %1870, %v599_v44   ;;  %1744 = vmatpush3.bf16.xpose.msra.mxu1 %v1811_v23  ;;  %v902_v44 = vld [vmem:[%s2347_s6 + $0x70] sm:$0xff] }
  0x33   : > { %1745 = vmatprep.subr.bf16.mxu1 %v1814_v26  ;;  %1813 = vmatprep.subr.bf16.mxu0 %v1944_v17 }
  0x34   : > { %664 = vperm.xlu1 %1869, %v602_v45   ;;  %v903_v45 = vld [vmem:[%s2347_s6 + $0x78] sm:$0xff] }
  0x36   : > { %669 = vperm.xlu0 %1870, %v603_v46  }
  0x38   : > { %674 = vperm.xlu1 %1869, %v604_v47   ;;  %v893_v47 = vld [vmem:[%s2347_s6 + $0x28] sm:$0xff] }
  0x39   : > { %1815 = vmatpush3.bf16.xpose.msra.mxu0 %v1814_v26 }
  0x3a   : > { %679 = vperm.xlu0 %1870, %v605_v48   ;;  %1746 = vmatpush3.bf16.xpose.msra.mxu1 %v1814_v26  ;;  %v385_v26 = vld [vmem:[%s2342_s1 + $0x78] sm:$0xff] }
  0x3b   : > { %1747 = vmatprep.subr.bf16.mxu1 %v1817_v31  ;;  %1816 = vmatprep.subr.bf16.mxu0 %v1944_v17 }
  0x3c   : > { %684 = vperm.xlu1 %1869, %v606_v49  }
  0x41   : > { %1818 = vmatpush3.bf16.xpose.msra.mxu0 %v1817_v31 }
  0x42   : > { %1748 = vmatpush3.bf16.xpose.msra.mxu1 %v1817_v31  ;;  %1819 = vmatprep.subr.bf16.mxu0 %v1944_v17 }
  0x43   : > { %1749 = vmatprep.subr.bf16.mxu1 %v1820_v36 }
  0x49   : > { %1821 = vmatpush3.bf16.xpose.msra.mxu0 %v1820_v36 }
  0x4a   : > { %1750 = vmatpush3.bf16.xpose.msra.mxu1 %v1820_v36  ;;  %1822 = vmatprep.subr.bf16.mxu0 %v1944_v17  ;;  %v890_v17 = vld [vmem:[%s2347_s6 + $0x10] sm:$0xff] }
  0x4b   : > { %1751 = vmatprep.subr.bf16.mxu1 %v1823_v40  ;;  %v898_v36 = vld [vmem:[%s2347_s6 + $0x50] sm:$0xff] }
  0x51   : > { %1824 = vmatpush3.bf16.xpose.msra.mxu0 %v1823_v40 }
  0x52   : > { %1752 = vmatpush3.bf16.xpose.msra.mxu1 %v1823_v40  ;;  %v900_v40 = vld [vmem:[%s2347_s6 + $0x60] sm:$0xff] }
  0x58   : > { %392 = vxpose.xlu0.b32.start [1/16] (narrow) %v370_v51, 8 }
  0x5c   : > { %393 = vxpose.xlu0.b32.cont [2/16] (narrow) %v371_v52, 8 }
  0x5f   : > { %1032 = vxpose.xlu1.c.b16.start [1/8] %v1879_v53, 128 }
  0x60   : > { %394 = vxpose.xlu0.b32.cont [3/16] (narrow) %v372_v54, 8 }
  0x63   : > { %1033 = vxpose.xlu1.c.b16.cont [2/8] %v1880_v55, 128 }
  0x64   : > { %395 = vxpose.xlu0.b32.cont [4/16] (narrow) %v373_v56, 8 }
  0x67   : > { %1034 = vxpose.xlu1.c.b16.cont [3/8] %v1881_v57, 128 }
  0x68   : > { %396 = vxpose.xlu0.b32.cont [5/16] (narrow) %v374_v58, 8 }
  0x6b   : > { %1035 = vxpose.xlu1.c.b16.cont [4/8] %v1882_v59, 128 }
  0x6c   : > { %397 = vxpose.xlu0.b32.cont [6/16] (narrow) %v375_v60, 8 }
  0x6f   : > { %1036 = vxpose.xlu1.c.b16.cont [5/8] %v1883_v61, 128 }
  0x70   : > { %398 = vxpose.xlu0.b32.cont [7/16] (narrow) %v376_v62, 8 }
  0x72   : > { %v743_v1 = vpop.trf.xlu0 }
  0x73   : > { %1037 = vxpose.xlu1.c.b16.cont [6/8] %v1884_v63, 128  ;;  %1753 = vmatprep.mubr.bf16.mxu1 %v743_v1 }
  0x74   : > { %399 = vxpose.xlu0.b32.cont [8/16] (narrow) %v377_v0, 8 }
  0x76   : > { %v744_v4 = vpop.trf.xlu0 }
  0x77   : > { %1038 = vxpose.xlu1.c.b16.cont [7/8] %v1885_v2, 128  ;;  %1754 = vmatmul.mubr.bf16.vlgmr.msra.gmra.mrb[0].mxu1 %v744_v4 }
  0x78   : > { %400 = vxpose.xlu0.b32.cont [9/16] (narrow) %v378_v3, 8 }
  0x7a   : > { %v745_v7 = vpop.trf.xlu0 }
  0x7b   : > { %1039 = vxpose.xlu1.c.b16.end [8/8] %v1886_v5, 128  ;;  %1757 = vmatprep.mubr.bf16.mxu1 %v745_v7 }
  0x7c   : > { %401 = vxpose.xlu0.b32.cont [10/16] (narrow) %v379_v6, 8 }
  0x7e   : > { %v746_v10 = vpop.trf.xlu0 }
  0x7f   : > { %389 = vperm.xlu1 %1869, %v386_v8   ;;  %1758 = vmatmul.mubr.bf16.gmra.mrb[4].mxu1 %v746_v10 }
  0x80   : > { %402 = vxpose.xlu0.b32.cont [11/16] (narrow) %v380_v9, 8 }
  0x82   : > { %v747_v13 = vpop.trf.xlu0 }
  0x83   : > { %906 = vperm.xlu1 %1869, %v888_v11   ;;  %1761 = vmatprep.mubr.bf16.mxu1 %v747_v13 }
  0x84   : > { %403 = vxpose.xlu0.b32.cont [12/16] (narrow) %v381_v12, 8 }
  0x86   : > { %v748_v16 = vpop.trf.xlu0 }
  0x87   : > { %911 = vperm.xlu1 %1869, %v889_v14   ;;  %1762 = vmatmul.mubr.bf16.gmra.mrb[8].mxu1 %v748_v16 }
  0x88   : > { %404 = vxpose.xlu0.b32.cont [13/16] (narrow) %v382_v15, 8 }
  0x8a   : > { %v749_v19 = vpop.trf.xlu0 }
  0x8b   : > { %916 = vperm.xlu1 %1869, %v890_v17   ;;  %v610_v20 = vpop.permute.xlu1 %609  ;;  %1765 = vmatprep.mubr.bf16.mxu1 %v749_v19 }
  0x8c   : > { %405 = vxpose.xlu0.b32.cont [14/16] (narrow) %v383_v18, 8 }
  0x8e   : > { %v750_v23 = vpop.trf.xlu0 }
  0x8f   : > { %921 = vperm.xlu1 %1869, %v891_v21   ;;  %v615_v24 = vpop.permute.xlu1 %614  ;;  %1766 = vmatmul.mubr.bf16.gmra.mrb[12].mxu1 %v750_v23 }
  0x90   : > { %406 = vxpose.xlu0.b32.cont [15/16] (narrow) %v384_v22, 8 }
  0x93   : > { %926 = vperm.xlu1 %1869, %v892_v25   ;;  %v620_v27 = vpop.permute.xlu1 %619 }
  0x94   : > { %407 = vxpose.xlu0.b32.end [16/16] (narrow) %v385_v26, 8 }
  0x97   : > { %936 = vperm.xlu1 %1869, %v894_v28   ;;  %v625_v29 = vpop.permute.xlu1 %624 }
  0x9b   : > { %941 = vperm.xlu1 %1869, %v895_v30   ;;  %v630_v31 = vpop.permute.xlu1 %629 }
  0x9f   : > { %946 = vperm.xlu1 %1869, %v896_v32   ;;  %v635_v33 = vpop.permute.xlu1 %634 }
  0xa3   : > { %951 = vperm.xlu1 %1869, %v897_v34   ;;  %v640_v35 = vpop.permute.xlu1 %639 }
  0xa7   : > { %956 = vperm.xlu1 %1869, %v898_v36   ;;  %v645_v37 = vpop.permute.xlu1 %644 }
  0xab   : > { %961 = vperm.xlu1 %1869, %v899_v38   ;;  %v2251_v39 = vpop.permute.xlu1 %654 }
  0xaf   : > { %966 = vperm.xlu1 %1869, %v900_v40   ;;  %v660_v41 = vpop.permute.xlu1 %659 }
  0xb1   : > { %v650_v50 = vpop.permute.xlu0 %649 }
  0xb3   : > { %971 = vperm.xlu1 %1869, %v901_v42   ;;  %v2259_v43 = vpop.permute.xlu1 %664 }
  0xb5   : > { %v2276_v52 = vpop.permute.xlu0 %669 }
  0xb7   : > { %976 = vperm.xlu1 %1869, %v902_v44   ;;  %v2267_v46 = vpop.permute.xlu1 %674 }
  0xb9   : > { %v2282_v55 = vpop.permute.xlu0 %679 }
  0xbb   : > { %981 = vperm.xlu1 %1869, %v903_v45   ;;  %v2272_v48 = vpop.permute.xlu1 %684 }
  0xbd   : > { %931 = vperm.xlu0 %1870, %v893_v47  }
  0xc5   : > { %v1040_v49 = vpop.trf.xlu1 }
  0xc9   : > { %v2274_v51 = vpop.trf.xlu1 }
  0xcd   : > { %v2278_v53 = vpop.trf.xlu1 }
  0xd1   : > { %v2280_v54 = vpop.trf.xlu1 }
  0xd5   : > { %v1044_v56 = vpop.trf.xlu1 }
  0xd6   : > { %1793 = vmatprep.mubr.bf16.mxu1 %v1044_v56 }
  0xd8   : > { %v408_v57 = vpop.trf.xlu0 }
  0xd9   : > { %1735 = vmatmul.mubr.f32.vlgmr.msra.gmra.mrb[0].mxu0 %v408_v57 }
  0xda   : > { %1785 = vmatprep.mubr.bf16.mxu0 %v1040_v49 }
 0x14a   : > { %v1755_v58 = vpop.f32.mrb[0].mxu1 }
 0x14b   : > { %v794_v59 = vadd.f32 %v1755_v58, %v620_v27  ;;  %v785_v60 = vpop.f32.mrb[1].mxu1 }
 0x14c   : > { %v786_v61 = vadd.f32 %v785_v60, %v610_v20  ;;  %v1756_v62 = vpop.f32.mrb[2].mxu1 }
 0x14d   : > { %v797_v63 = vadd.f32 %v1756_v62, %v625_v29  ;;  %v788_v0 = vpop.f32.mrb[3].mxu1  ;;  %v850_v2 = vmax.f32 %v794_v59, 0.0 }
 0x14e   : > { %v789_v1 = vadd.f32 %v788_v0, %v615_v24  ;;  %v848_v4 = vmax.f32 %v786_v61, 0.0 }
 0x14f   : > { %v851_v3 = vmax.f32 %v797_v63, 0.0 }
 0x150   : > { %v849_v5 = vmax.f32 %v789_v1, 0.0 }
 0x151   : > { %v865_v6 = vpack.c.bf16 %v851_v3, %v850_v2 }
 0x152   : > { %v864_v7 = vpack.c.bf16 %v849_v5, %v848_v4  ;;  %v1759_v8 = vpop.f32.mrb[4].mxu1 }
 0x153   : > { %v810_v9 = vadd.f32 %v1759_v8, %v640_v35  ;;  %v801_v10 = vpop.f32.mrb[5].mxu1 }
 0x154   : > { %v802_v11 = vadd.f32 %v801_v10, %v630_v31  ;;  %v1760_v12 = vpop.f32.mrb[6].mxu1  ;;  %1769 = vmatprep.subr.bf16.mxu0 %v864_v7  ;;  %1825 = vmatprep.subr.bf16.mxu1 %v864_v7 }
 0x155   : > { %v813_v13 = vadd.f32 %v1760_v12, %v645_v37  ;;  %v804_v14 = vpop.f32.mrb[7].mxu1  ;;  %1770 = vmatpush3.bf16.msra.mxu0 %v864_v7  ;;  %1833 = vmatpush3.bf16.msra.mxu1 %v864_v7  ;;  %v854_v16 = vmax.f32 %v810_v9, 0.0 }
 0x156   : > { %v805_v15 = vadd.f32 %v804_v14, %v635_v33  ;;  %1771 = vmatprep.subr.bf16.mxu0 %v865_v6  ;;  %1826 = vmatprep.subr.bf16.mxu1 %v865_v6  ;;  %v852_v18 = vmax.f32 %v802_v11, 0.0 }
 0x157   : > { %v855_v17 = vmax.f32 %v813_v13, 0.0 }
 0x158   : > { %v853_v19 = vmax.f32 %v805_v15, 0.0 }
 0x159   : > { %v867_v20 = vpack.c.bf16 %v855_v17, %v854_v16  ;;  %1772 = vmatpush3.bf16.msra.mxu0 %v865_v6  ;;  %1834 = vmatpush3.bf16.msra.mxu1 %v865_v6 }
 0x15a   : > { %v866_v21 = vpack.c.bf16 %v853_v19, %v852_v18  ;;  %v1763_v22 = vpop.f32.mrb[8].mxu1 }
 0x15b   : > { %v826_v23 = vadd.f32 %v1763_v22, %v660_v41  ;;  %v817_v24 = vpop.f32.mrb[9].mxu1 }
 0x15c   : > { %v818_v25 = vadd.f32 %v817_v24, %v650_v50  ;;  %v1764_v26 = vpop.f32.mrb[10].mxu1  ;;  %1773 = vmatprep.subr.bf16.mxu0 %v866_v21  ;;  %1827 = vmatprep.subr.bf16.mxu1 %v866_v21 }
 0x15d   : > { %v829_v27 = vadd.f32 %v1764_v26, %v2259_v43  ;;  %v820_v28 = vpop.f32.mrb[11].mxu1  ;;  %1774 = vmatpush3.bf16.msra.mxu0 %v866_v21  ;;  %1835 = vmatpush3.bf16.msra.mxu1 %v866_v21  ;;  %v858_v30 = vmax.f32 %v826_v23, 0.0 }
 0x15e   : > { %v821_v29 = vadd.f32 %v820_v28, %v2251_v39  ;;  %1775 = vmatprep.subr.bf16.mxu0 %v867_v20  ;;  %1828 = vmatprep.subr.bf16.mxu1 %v867_v20  ;;  %v856_v32 = vmax.f32 %v818_v25, 0.0 }
 0x15f   : > { %v859_v31 = vmax.f32 %v829_v27, 0.0 }
 0x160   : > { %v857_v33 = vmax.f32 %v821_v29, 0.0 }
 0x161   : > { %v869_v34 = vpack.c.bf16 %v859_v31, %v858_v30  ;;  %1776 = vmatpush3.bf16.msra.mxu0 %v867_v20  ;;  %1836 = vmatpush3.bf16.msra.mxu1 %v867_v20 }
 0x162   : > { %v868_v35 = vpack.c.bf16 %v857_v33, %v856_v32  ;;  %v1767_v36 = vpop.f32.mrb[12].mxu1 }
 0x163   : > { %v842_v37 = vadd.f32 %v1767_v36, %v2282_v55  ;;  %v833_v38 = vpop.f32.mrb[13].mxu1 }
 0x164   : > { %v834_v40 = vadd.f32 %v833_v38, %v2276_v52  ;;  %v1768_v41 = vpop.f32.mrb[14].mxu1  ;;  %1777 = vmatprep.subr.bf16.mxu0 %v868_v35  ;;  %1829 = vmatprep.subr.bf16.mxu1 %v868_v35 }
 0x165   : > { %v845_v39 = vadd.f32 %v1768_v41, %v2272_v48  ;;  %v836_v42 = vpop.f32.mrb[15].mxu1  ;;  %1778 = vmatpush3.bf16.msra.mxu0 %v868_v35  ;;  %1837 = vmatpush3.bf16.msra.mxu1 %v868_v35  ;;  %v862_v44 = vmax.f32 %v842_v37, 0.0  ;;  %v1045_v48 = vpop.trf.xlu1 }
 0x166   : > { %v837_v43 = vadd.f32 %v836_v42, %v2267_v46  ;;  %1779 = vmatprep.subr.bf16.mxu0 %v869_v34  ;;  %1830 = vmatprep.subr.bf16.mxu1 %v869_v34  ;;  %v860_v47 = vmax.f32 %v834_v40, 0.0  ;;  %v932_v37 = vpop.permute.xlu0 %931 }
 0x167   : > { %v863_v45 = vmax.f32 %v845_v39, 0.0 }
 0x168   : > { %v861_v49 = vmax.f32 %v837_v43, 0.0 }
 0x169   : > { %v871_v50 = vpack.c.bf16 %v863_v45, %v862_v44  ;;  %1780 = vmatpush3.bf16.msra.mxu0 %v869_v34  ;;  %1838 = vmatpush3.bf16.msra.mxu1 %v869_v34  ;;  %v1046_v46 = vpop.trf.xlu1 }
 0x16a   : > { %v870_v52 = vpack.c.bf16 %v861_v49, %v860_v47 }
 0x16c   : > { %1781 = vmatprep.subr.bf16.mxu0 %v870_v52  ;;  %1831 = vmatprep.subr.bf16.mxu1 %v870_v52 }
 0x16d   : > { %1782 = vmatpush3.bf16.msra.mxu0 %v870_v52  ;;  %1839 = vmatpush3.bf16.msra.mxu1 %v870_v52  ;;  %v1047_v55 = vpop.trf.xlu1 }
 0x16e   : > { %1783 = vmatprep.subr.bf16.mxu0 %v871_v50  ;;  %1832 = vmatprep.subr.bf16.mxu1 %v871_v50 }
 0x171   : > { %1784 = vmatpush3.bf16.msra.mxu0 %v871_v50  ;;  %1840 = vmatpush3.bf16.msra.mxu1 %v871_v50  ;;  %v390_v56 = vpop.permute.xlu1 %389 }
 0x174   : > { %1786 = vmatmul.mubr.bf16.vlgmr.msra.gmra.mrb[4].mxu0 %v2274_v51  ;;  %1794 = vmatmul.mubr.bf16.vlgmr.msra.gmra.mrb[16].mxu1 %v1045_v48 }
 0x175   : > { %1789 = vmatprep.mubr.bf16.mxu0 %v2278_v53  ;;  %1797 = vmatprep.mubr.bf16.mxu1 %v1046_v46  ;;  %v907_v51 = vpop.permute.xlu1 %906 }
 0x179   : > { %v912_v60 = vpop.permute.xlu1 %911 }
 0x17c   : > { %1790 = vmatmul.mubr.bf16.gmra.mrb[8].mxu0 %v2280_v54  ;;  %1798 = vmatmul.mubr.bf16.gmra.mrb[20].mxu1 %v1047_v55 }
 0x17d   : > { %v917_v53 = vpop.permute.xlu1 %916 }
 0x181   : > { %v922_v61 = vpop.permute.xlu1 %921 }
 0x185   : > { %v927_v62 = vpop.permute.xlu1 %926 }
 0x189   : > { %v937_v63 = vpop.permute.xlu1 %936 }
 0x18d   : > { %v942_v54 = vpop.permute.xlu1 %941 }
 0x191   : > { %v947_v0 = vpop.permute.xlu1 %946 }
 0x195   : > { %v952_v1 = vpop.permute.xlu1 %951 }
 0x199   : > { %v957_v2 = vpop.permute.xlu1 %956 }
 0x19d   : > { %v962_v3 = vpop.permute.xlu1 %961 }
 0x1a1   : > { %v967_v4 = vpop.permute.xlu1 %966 }
 0x1a5   : > { %v972_v5 = vpop.permute.xlu1 %971 }
 0x1a9   : > { %v977_v6 = vpop.permute.xlu1 %976 }
 0x1ac   : > { %v490_v57 = vpop.f32.mrb[0].mxu0 }
 0x1ad   : > { %v491_v58 = vadd.f32 %v490_v57, %v390_v56  ;;  %v1736_v59 = vpop.f32.mrb[1].mxu0  ;;  %v982_v23 = vpop.permute.xlu1 %981 }
 0x1af   : > { %494 = vst [vmem:[%s346_s28] sm:$0xf] %v491_v58 }
 0x247   : > { %v1787_v7 = vpop.f32.mrb[4].mxu0  ;;  %v1795_v8 = vpop.f32.mrb[16].mxu1 }
 0x248   : > { %v1091_v9 = vadd.f32 %v1787_v7, %v917_v53  ;;  %v1123_v10 = vadd.f32 %v1795_v8, %v957_v2  ;;  %v1082_v11 = vpop.f32.mrb[5].mxu0  ;;  %v1114_v12 = vpop.f32.mrb[17].mxu1 }
 0x249   : > { %v1083_v13 = vadd.f32 %v1082_v11, %v907_v51  ;;  %v1115_v14 = vadd.f32 %v1114_v12, %v947_v0  ;;  %v1788_v15 = vpop.f32.mrb[6].mxu0  ;;  %v1796_v16 = vpop.f32.mrb[18].mxu1 }
 0x24a   : > { %1887 = vtanh.f32 %v1091_v9  ;;  %v1094_v17 = vadd.f32 %v1788_v15, %v922_v61  ;;  %v1085_v18 = vpop.f32.mrb[7].mxu0  ;;  %v1117_v19 = vpop.f32.mrb[19].mxu1  ;;  %v1126_v20 = vadd.f32 %v1796_v16, %v962_v3 }
 0x24b   : > { %1889 = vtanh.f32 %v1123_v10  ;;  %v1086_v21 = vadd.f32 %v1085_v18, %v912_v60  ;;  %v1118_v22 = vadd.f32 %v1117_v19, %v952_v1 }
 0x24c   : > { %1891 = vtanh.f32 %v1083_v13 }
 0x24d   : > { %1893 = vtanh.f32 %v1115_v14 }
 0x24e   : > { %1895 = vtanh.f32 %v1094_v17 }
 0x24f   : > { %1897 = vtanh.f32 %v1126_v20  ;;  %v1791_v24 = vpop.f32.mrb[8].mxu0  ;;  %v1799_v25 = vpop.f32.mrb[20].mxu1 }
 0x250   : > { %1899 = vtanh.f32 %v1086_v21  ;;  %v1107_v26 = vadd.f32 %v1791_v24, %v937_v63  ;;  %v1139_v27 = vadd.f32 %v1799_v25, %v977_v6  ;;  %v1098_v28 = vpop.f32.mrb[9].mxu0  ;;  %v1130_v29 = vpop.f32.mrb[21].mxu1 }
 0x251   : > { %1901 = vtanh.f32 %v1118_v22  ;;  %v1099_v30 = vadd.f32 %v1098_v28, %v927_v62  ;;  %v1131_v31 = vadd.f32 %v1130_v29, %v967_v4  ;;  %v1792_v32 = vpop.f32.mrb[10].mxu0  ;;  %v1800_v33 = vpop.f32.mrb[22].mxu1 }
 0x252   : > { %1903 = vtanh.f32 %v1107_v26  ;;  %v1110_v34 = vadd.f32 %v1792_v32, %v942_v54  ;;  %v1101_v35 = vpop.f32.mrb[11].mxu0  ;;  %v1133_v36 = vpop.f32.mrb[23].mxu1  ;;  %v1142_v38 = vadd.f32 %v1800_v33, %v982_v23 }
 0x253   : > { %1905 = vtanh.f32 %v1139_v27  ;;  %v1102_v41 = vadd.f32 %v1101_v35, %v932_v37  ;;  %v1134_v42 = vadd.f32 %v1133_v36, %v972_v5 }
 0x254   : > { %v1888_v40 = vpop.eup %1887  ;;  %1907 = vtanh.f32 %v1099_v30 }
 0x255   : > { %v1890_v39 = vpop.eup %1889  ;;  %1909 = vtanh.f32 %v1131_v31 }
 0x256   : > { %v1892_v43 = vpop.eup %1891  ;;  %1911 = vtanh.f32 %v1110_v34 }
 0x257   : > { %v1894_v44 = vpop.eup %1893  ;;  %1913 = vtanh.f32 %v1142_v38 }
 0x258   : > { %v1896_v45 = vpop.eup %1895  ;;  %1915 = vtanh.f32 %v1102_v41 }
 0x259   : > { %v1898_v47 = vpop.eup %1897  ;;  %v1607_v49 = vpack.c.bf16 %v1896_v45, %v1888_v40  ;;  %1917 = vtanh.f32 %v1134_v42 }
 0x25a   : > { %v1900_v50 = vpop.eup %1899  ;;  %v1627_v52 = vpack.c.bf16 %v1898_v47, %v1890_v39 }
 0x25b   : > { %v1902_v48 = vpop.eup %1901  ;;  %1646 = vst [vmem:[%s2299_s30 + $0x8] sm:$0xff] %v1607_v49   ;;  %v1602_v46 = vpack.c.bf16 %v1900_v50, %v1892_v43 }
 0x25c   : > { %v1904_v55 = vpop.eup %1903  ;;  %1650 = vst [vmem:[%s2299_s30 + $0x28] sm:$0xff] %v1627_v52   ;;  %v1622_v56 = vpack.c.bf16 %v1902_v48, %v1894_v44 }
 0x25d   : > { %v1906_v57 = vpop.eup %1905  ;;  %1603 = vst [vmem:[%s2299_s30] sm:$0xff] %v1602_v46  }
 0x25e   : > { %v1908_v58 = vpop.eup %1907  ;;  %1649 = vst [vmem:[%s2299_s30 + $0x20] sm:$0xff] %v1622_v56  }
 0x25f   : > { %v1910_v59 = vpop.eup %1909 }
 0x260   : > { %v1912_v51 = vpop.eup %1911  ;;  %1259 = sbr.rel (!%p2022_p4) target bundleno = 624 (0x270), region = 56 }
 0x261   : > { %v1914_v60 = vpop.eup %1913  ;;  %v1617_v53 = vpack.c.bf16 %v1912_v51, %v1904_v55 }
 0x262   : > { %v1916_v61 = vpop.eup %1915  ;;  %v1637_v62 = vpack.c.bf16 %v1914_v60, %v1906_v57  ;;  %v1281_v3 = vld [vmem:[%s2299_s30 + $0x8] sm:$0xf] (%p2022_p4)  ;;  %v1283_v4 = vld [vmem:[%s2299_s30 + $0xc] sm:$0xf] (%p2022_p4) }
 0x263   : > { %v1918_v63 = vpop.eup %1917  ;;  %1648 = vst [vmem:[%s2299_s30 + $0x18] sm:$0xff] %v1617_v53   ;;  %v1612_v54 = vpack.c.bf16 %v1916_v61, %v1908_v58  ;;  %1282 = vst [vmem:[%s1261_s18 + $0x18] sm:$0xf] (%p2022_p4), %v1281_v3  ;;  %v1297_v11 = vld [vmem:[%s2299_s30 + $0x28] sm:$0xf] (%p2022_p4) }
 0x264   : > { %1652 = vst [vmem:[%s2299_s30 + $0x38] sm:$0xff] %v1637_v62   ;;  %v1632_v0 = vpack.c.bf16 %v1918_v63, %v1910_v59  ;;  %v1277_v1 = vld [vmem:[%s2299_s30] sm:$0xf] (%p2022_p4)  ;;  %v1279_v2 = vld [vmem:[%s2299_s30 + $0x4] sm:$0xf] (%p2022_p4) }
 0x265   : > { %1647 = vst [vmem:[%s2299_s30 + $0x10] sm:$0xff] %v1612_v54   ;;  %1278 = vst [vmem:[%s1261_s18] sm:$0xf] (%p2022_p4), %v1277_v1  ;;  %v1293_v9 = vld [vmem:[%s2299_s30 + $0x20] sm:$0xf] (%p2022_p4)  ;;  %v1295_v10 = vld [vmem:[%s2299_s30 + $0x24] sm:$0xf] (%p2022_p4) }
 0x266   : > { %1651 = vst [vmem:[%s2299_s30 + $0x30] sm:$0xff] %v1632_v0   ;;  %1280 = vst [vmem:[%s1261_s18 + $0xc] sm:$0xf] (%p2022_p4), %v1279_v2  ;;  %v1299_v12 = vld [vmem:[%s2299_s30 + $0x2c] sm:$0xf] (%p2022_p4) }
 0x267   : > { %1284 = vst [vmem:[%s1261_s18 + $0x24] sm:$0xf] %v1283_v4  ;;  %1294 = vst [vmem:[%s1261_s18 + $0x60] sm:$0xf] %v1293_v9 }
 0x268   : > { %1296 = vst [vmem:[%s1261_s18 + $0x6c] sm:$0xf] %v1295_v10  ;;  %1298 = vst [vmem:[%s1261_s18 + $0x78] sm:$0xf] %v1297_v11 }
 0x269   : > { %1300 = vst [vmem:[%s1261_s18 + $0x84] sm:$0xf] %v1299_v12 }
 0x26a   : > { %v1289_v7 = vld [vmem:[%s2299_s30 + $0x18] sm:$0xf]  ;;  %v1291_v8 = vld [vmem:[%s2299_s30 + $0x1c] sm:$0xf] }
 0x26b   : > { %1290 = vst [vmem:[%s1261_s18 + $0x48] sm:$0xf] %v1289_v7  ;;  %1292 = vst [vmem:[%s1261_s18 + $0x54] sm:$0xf] %v1291_v8  ;;  %v1305_v15 = vld [vmem:[%s2299_s30 + $0x38] sm:$0xf] }
 0x26c   : > { %v1285_v5 = vld [vmem:[%s2299_s30 + $0x10] sm:$0xf]  ;;  %v1287_v6 = vld [vmem:[%s2299_s30 + $0x14] sm:$0xf]  ;;  %v1307_v16 = vld [vmem:[%s2299_s30 + $0x3c] sm:$0xf] }
 0x26d   : > { %1286 = vst [vmem:[%s1261_s18 + $0x30] sm:$0xf] %v1285_v5  ;;  %1288 = vst [vmem:[%s1261_s18 + $0x3c] sm:$0xf] %v1287_v6  ;;  %v1301_v13 = vld [vmem:[%s2299_s30 + $0x30] sm:$0xf] }
 0x26e   : > { %v1303_v14 = vld [vmem:[%s2299_s30 + $0x34] sm:$0xf]  ;;  %1302 = vst [vmem:[%s1261_s18 + $0x90] sm:$0xf] %v1301_v13  ;;  %1306 = vst [vmem:[%s1261_s18 + $0xa8] sm:$0xf] %v1305_v15 }
 0x26f   : > { %1304 = vst [vmem:[%s1261_s18 + $0x9c] sm:$0xf] %v1303_v14  ;;  %1308 = vst [vmem:[%s1261_s18 + $0xb4] sm:$0xf] %v1307_v16 }
 0x270 PF: > { %p17_p9 = scmp.ge.s32.totalorder %s2012_s13, 5   ;;  %s2352_s30 = smov %s1937_s10 }
 0x271   : > { %s2353_s10 = smov %s2020_s16  ;;  %s2354_s11 = smov %s2012_s13 }
 0x272   :  { %19 = sbr.rel (!%p17_p9) target bundleno = 2 (0x2), region = 143 }

// kernel: milnet_buffer_forward.3
= control target key start
LH: loop header
LB: loop body
LE: loop exit
PB: predicated region body
PF: predicated region fallthrough
CT: control target
= control target key end

     0   :  { %15 = vsyncpa [#allocation7], 0  ;;  %s2416_s0 = inlined_call_operand.vmem [shape: bf16[128,384], index: 0, kind: input, shape index: {}]   ;;  %s2417_s1 = inlined_call_operand.vmem [shape: bf16[384,128], index: 1, kind: input, shape index: {}]   ;;  %s2418_s2 = inlined_call_operand.vmem [shape: bf16[128,4], index: 2, kind: input, shape index: {}]   ;;  %s2419_s3 = inlined_call_operand.vmem [shape: f32[4,128,4], index: 3, kind: input, shape index: {}]   ;;  %s2420_s4 = inlined_call_operand.vmem [shape: f32[1,4], index: 4, kind: input, shape index: {}]   ;;  %s2421_s5 = inlined_call_operand.vmem [shape: f32[4,384], index: 5, kind: output, shape index: {0}]   ;;  %s2422_s6 = inlined_call_operand.vmem [shape: f32[4,1], index: 6, kind: output, shape index: {1}]   ;;  %s2423_s7 = inlined_call_operand.vmem [shape: f32[4,1], index: 7, kind: output, shape index: {2}]   ;;  %s2424_s8 = inlined_call_operand.hbm [shape: f32[4,128], index: 8, kind: output, shape index: {3}]   ;;  %s2425_s9 = inlined_call_operand.hbm [shape: f32[1,4], index: 9, kind: output, shape index: {4}]  }
   0x1   :  { %16 = vsyncpa [#allocation9], 0  ;;  %s1973_s30 = smov 0   ;;  %s1975_s10 = smov 0  }
   0x2   :  { %s1977_s11 = smov 0  }
   0x3 LB: > { %s1989_s12 = sadd.s32 4294967295, %s1910_s11   ;;  %s1992_s13 = sadd.s32 1, %s1910_s11   ;;  %s1910_s11 = sphi %s1977_s11, %s2428_s11   ;;  %s1906_s10 = sphi %s1975_s10, %s2427_s10   ;;  %s1902_s30 = sphi %s1973_s30, %s2426_s30  }
   0x4   : > { %s26_s14 = ssub.s32 %s1910_s11, %s1992_s13  ;;  %s29_s15 = sadd.s32 1, %s1906_s10 }
   0x5   : > { %p27_p0 = scmp.eq.s32.totalorder %s26_s14, 0  ;;  %p36_p1 = scmp.ne.s32.totalorder %s1906_s10, %s1902_s30 }
   0x6   : > { %p37_p2 = scmp.eq.s32.totalorder %s1910_s11, 0  ;;  %p1297_p4 = scmp.ge.s32.totalorder %s1910_s11, 3 }
   0x7   : > { %s2001_s16 = scalar_select %p27_p0, %s1906_s10, %s29_s15  }
   0x8   : > { %p38_p3 = por %p37_p2, %p36_p1  ;;  %270 = sbr.rel (%p1297_p4) target bundleno = 29 (0x1d), region = 28 }
   0xf   : > { %273 = sbr.rel (!%p38_p3) target bundleno = 29 (0x1d), region = 32  ;;  %s275_s17 = sand.u32 (%p38_p3), 1, %s1906_s10  }
  0x10   : > { %s1299_s18 = sshll.u32 (%p38_p3), %s1910_s11, 2  ;;  %s1298_s19 = sshll.u32 (%p38_p3), %s275_s17, 6 }
  0x11   : > { %s2009_s22 = scalar_lea.vmem (%p38_p3), %s2416_s0, %s1299_s18  ;;  %s277_s23 = scalar_lea.vmem (%p38_p3), [#allocation5], %s1298_s19 }
  0x12   : > { %v295_v0 = vld [vmem:[%s2009_s22] sm:$0xf] (%p38_p3)  ;;  %v297_v1 = vld [vmem:[%s2009_s22 + $0xc] sm:$0xf] (%p38_p3)  ;;  %v299_v2 = vld [vmem:[%s2009_s22 + $0x18] sm:$0xf] (%p38_p3) }
  0x13   : > { %296 = vst [vmem:[%s277_s23] sm:$0xf] (%p38_p3), %v295_v0  ;;  %298 = vst [vmem:[%s277_s23 + $0x4] sm:$0xf] (%p38_p3), %v297_v1  ;;  %v301_v3 = vld [vmem:[%s2009_s22 + $0x24] sm:$0xf] (%p38_p3) }
  0x14   : > { %v303_v4 = vld [vmem:[%s2009_s22 + $0x30] sm:$0xf] (%p38_p3)  ;;  %300 = vst [vmem:[%s277_s23 + $0x8] sm:$0xf] (%p38_p3), %v299_v2  ;;  %302 = vst [vmem:[%s277_s23 + $0xc] sm:$0xf] (%p38_p3), %v301_v3 }
  0x15   : > { %304 = vst [vmem:[%s277_s23 + $0x10] sm:$0xf] (%p38_p3), %v303_v4  ;;  %v305_v5 = vld [vmem:[%s2009_s22 + $0x3c] sm:$0xf] (%p38_p3)  ;;  %v307_v6 = vld [vmem:[%s2009_s22 + $0x48] sm:$0xf] (%p38_p3) }
  0x16   : > { %v309_v7 = vld [vmem:[%s2009_s22 + $0x54] sm:$0xf]  ;;  %306 = vst [vmem:[%s277_s23 + $0x14] sm:$0xf] %v305_v5  ;;  %308 = vst [vmem:[%s277_s23 + $0x18] sm:$0xf] %v307_v6 }
  0x17   : > { %310 = vst [vmem:[%s277_s23 + $0x1c] sm:$0xf] %v309_v7  ;;  %v311_v8 = vld [vmem:[%s2009_s22 + $0x60] sm:$0xf]  ;;  %v313_v9 = vld [vmem:[%s2009_s22 + $0x6c] sm:$0xf] }
  0x18   : > { %v315_v10 = vld [vmem:[%s2009_s22 + $0x78] sm:$0xf]  ;;  %312 = vst [vmem:[%s277_s23 + $0x20] sm:$0xf] %v311_v8  ;;  %314 = vst [vmem:[%s277_s23 + $0x24] sm:$0xf] %v313_v9 }
  0x19   : > { %316 = vst [vmem:[%s277_s23 + $0x28] sm:$0xf] %v315_v10  ;;  %v317_v11 = vld [vmem:[%s2009_s22 + $0x84] sm:$0xf]  ;;  %v319_v12 = vld [vmem:[%s2009_s22 + $0x90] sm:$0xf] }
  0x1a   : > { %v321_v13 = vld [vmem:[%s2009_s22 + $0x9c] sm:$0xf]  ;;  %318 = vst [vmem:[%s277_s23 + $0x2c] sm:$0xf] %v317_v11  ;;  %320 = vst [vmem:[%s277_s23 + $0x30] sm:$0xf] %v319_v12 }
  0x1b   : > { %322 = vst [vmem:[%s277_s23 + $0x34] sm:$0xf] %v321_v13  ;;  %v323_v14 = vld [vmem:[%s2009_s22 + $0xa8] sm:$0xf]  ;;  %v325_v15 = vld [vmem:[%s2009_s22 + $0xb4] sm:$0xf] }
  0x1c   : > { %324 = vst [vmem:[%s277_s23 + $0x38] sm:$0xf] %v323_v14  ;;  %326 = vst [vmem:[%s277_s23 + $0x3c] sm:$0xf] %v325_v15 }
  0x1d PF: > { %p1300_p5 = scmp.ge.s32.totalorder %s1910_s11, 1  ;;  %p389_p6 = scmp.lt.s32.totalorder %s1910_s11, 4 }
  0x1f   : > { %p390_p7 = pnand %p1300_p5, %p389_p6 }
  0x20   : > { %s396_s24 = sand.u32 (!%p390_p7), 1, %s1902_s30   ;;  %s1302_s25 = sshll.u32 (!%p390_p7), %s1989_s12, 4 }
  0x21   : > { %393 = sbr.rel (%p390_p7) target bundleno = 1250 (0x4e2), region = 77  ;;  %s1301_s26 = sshll.u32 (!%p390_p7), %s396_s24, 6 }
  0x22   : > { %p436_p8 = scmp.lt.s32.totalorder (!%p390_p7), %s1302_s25, 47  ;;  %p441_p9 = scmp.lt.s32.totalorder (!%p390_p7), %s1989_s12, 2 }
  0x23   : > { %s2043_s20 = scalar_lea.vmem (!%p390_p7), [#allocation5], %s1301_s26  ;;  %p1305_p10 = scmp.ne.s32.totalorder (!%p390_p7), %s1989_s12, 0 }
  0x28   : > { %s2430_s25 = smov (!%p436_p8, %s1302_s25), 47  ;;  %449 = sbr.rel (%p1305_p10) target bundleno = 47 (0x2f), region = 85 }
  0x29   : > { %s442_s27 = scalar_select %p441_p9, %s1989_s12, 2 }
  0x2a   : > { %s1303_s28 = sshll.u32 %s2430_s25, 2  ;;  %vm450_vm0 = vcmask (!%p1305_p10), 3072   ;;  %v1912_v16 = vmov (!%p1305_p10), -inf   ;;  %v1913_v17 = vmov (!%p1305_p10), 0.0  }
  0x2b   : > { %s2036_s15 = scalar_lea.vmem %s2417_s1, %s1303_s28  ;;  %s1304_s11 = sshll.u32 %s442_s27, 2  ;;  %451 = vst.msk [vmem:[#allocation2] sm:$0xf] (!%p1305_p10), %vm450_vm0, %v1912_v16  ;;  %452 = vst.msk [vmem:[#allocation3] sm:$0xf] (!%p1305_p10), %vm450_vm0, %v1913_v17 }
  0x2c   : > { %s2041_s19 = scalar_lea.vmem %s2421_s5, %s1304_s11  ;;  %453 = vst [vmem:[#allocation4] sm:$0xf] (!%p1305_p10), %v1913_v17 }
  0x2f PF: > { %v1797_v18 = vld [vmem:[%s2418_s2] sm:$0xff]   ;;  %v1914_v19 = vmov 0.0   ;;  %v1798_v20 = vld [vmem:[%s2418_s2 + $0x8] sm:$0xff]   ;;  %vm1915_vm1 = vmmov 0   ;;  %v1799_v21 = vld [vmem:[%s2418_s2 + $0x10] sm:$0xff]   ;;  %v638_v36 = vlaneseq  ;;  %s1322_s22 = sshll.u32 %s1989_s12, 7 }
  0x30   : > { %1472 = vmatprep.subr.bf16.mxu0 %v1914_v19  ;;  %1492 = vmatprep.subr.bf16.mxu1 %v1914_v19  ;;  %v1805_v22 = vld [vmem:[%s2043_s20] sm:$0xff]   ;;  %v1800_v23 = vld [vmem:[%s2418_s2 + $0x18] sm:$0xff]   ;;  %v1801_v25 = vld [vmem:[%s2418_s2 + $0x20] sm:$0xff]   ;;  %v641_v38 = vstv %s1322_s22  ;;  %vm647_vm3 = vcmask 1043456   ;;  %v1916_v46 = vmov 0   ;;  %vm669_vm4 = vcmask 3072  }
  0x31   : > { %534 = vxpose.xlu0.c.b16.start [1/8] (narrow) %v1797_v18, 16  ;;  %1488 = vmatprep.mubr.msk.bf16.mxu0 %vm1915_vm1, %v1914_v19  ;;  %v1806_v24 = vld [vmem:[%s2043_s20 + $0x8] sm:$0xff]   ;;  %v1807_v26 = vld [vmem:[%s2043_s20 + $0x10] sm:$0xff]   ;;  %v1802_v27 = vld [vmem:[%s2418_s2 + $0x28] sm:$0xff]   ;;  %v639_v37 = vand.u32 127, %v638_v36  ;;  %p1331_p11 = scmp.ne.s32.totalorder %s1989_s12, 2 }
  0x32   : > { %1508 = vmatprep.mubr.msk.bf16.mxu1 %vm1915_vm1, %v1914_v19  ;;  %1473 = vmatpush3.bf16.msra.mxu0 %v1805_v22  ;;  %v1808_v28 = vld [vmem:[%s2043_s20 + $0x18] sm:$0xff]   ;;  %v1803_v29 = vld [vmem:[%s2418_s2 + $0x30] sm:$0xff]   ;;  %v1804_v31 = vld [vmem:[%s2418_s2 + $0x38] sm:$0xff]   ;;  %v1917_v17 = vmov (!%p1331_p11), 0   ;;  %vm1919_vm5 = vmmov (!%p1331_p11), 0   ;;  %vm1163_vm6 = vcmask (!%p1331_p11), 24576  }
  0x33   : > { %1474 = vmatprep.subr.bf16.mxu0 %v1914_v19  ;;  %v1809_v30 = vld [vmem:[%s2043_s20 + $0x20] sm:$0xff]   ;;  %v1810_v32 = vld [vmem:[%s2043_s20 + $0x28] sm:$0xff]   ;;  %v1811_v33 = vld [vmem:[%s2043_s20 + $0x30] sm:$0xff]   ;;  %v642_v39 = vadd.s32 %v641_v38, %v639_v37  ;;  %1795 = vset.pattern.permute.xlu1 %v1916_v46 }
  0x34   : > { %v1812_v34 = vld [vmem:[%s2043_s20 + $0x38] sm:$0xff]   ;;  %v1815_v49 = vld [vmem:[%s2036_s15 + $0x10] sm:$0xff]   ;;  %v1816_v50 = vld [vmem:[%s2036_s15 + $0x18] sm:$0xff]  }
  0x35   : > { %535 = vxpose.xlu0.c.b16.cont [2/8] (narrow) %v1798_v20, 16  ;;  %vm643_vm2 = vcmp.lt.s32.totalorder %v642_v39, 300  ;;  %v1813_v47 = vld [vmem:[%s2036_s15] sm:$0xff]   ;;  %v1814_v48 = vld [vmem:[%s2036_s15 + $0x8] sm:$0xff]   ;;  %v1819_v58 = vld [vmem:[%s2036_s15 + $0x30] sm:$0xff]  }
  0x36   : > { %1475 = vmatpush3.bf16.msra.mxu0 %v1806_v24  ;;  %1493 = vmatpush3.bf16.msra.mxu1 %v1813_v47  ;;  %v646_v51 = vld [vmem:[#allocation2] sm:$0xf]  ;;  %v1818_v57 = vld [vmem:[%s2036_s15 + $0x28] sm:$0xff]   ;;  %v1820_v59 = vld [vmem:[%s2036_s15 + $0x38] sm:$0xff]  }
  0x37   : > { %1476 = vmatprep.subr.bf16.mxu0 %v1914_v19  ;;  %1494 = vmatprep.subr.bf16.mxu1 %v1914_v19  ;;  %v1817_v55 = vld [vmem:[%s2036_s15 + $0x20] sm:$0xff]   ;;  %v671_v7 = vld [vmem:[#allocation4] sm:$0xf]  ;;  %v1338_v38 = vld [vmem:[%s2419_s3 + $0xb0] sm:$0xff] (!%p1331_p11) }
  0x38   : > { %v663_v3 = vld [vmem:[#allocation3] sm:$0xf]  ;;  %v1349_v24 = vld [vmem:[%s2419_s3 + $0x108] sm:$0xff] (!%p1331_p11)  ;;  %v1339_v39 = vld [vmem:[%s2419_s3 + $0xb8] sm:$0xff] (!%p1331_p11) }
  0x39   : > { %536 = vxpose.xlu0.c.b16.cont [3/8] (narrow) %v1799_v21, 16  ;;  %v1332_v20 = vld [vmem:[%s2419_s3 + $0x80] sm:$0xff] (!%p1331_p11)  ;;  %v1333_v21 = vld [vmem:[%s2419_s3 + $0x88] sm:$0xff] (!%p1331_p11) }
  0x3a   : > { %1477 = vmatpush3.bf16.msra.mxu0 %v1807_v26  ;;  %1495 = vmatpush3.bf16.msra.mxu1 %v1814_v48  ;;  %v1653_v22 = vpack.c.bf16 (!%p1331_p11), %v1333_v21, %v1332_v20  ;;  %v1356_v47 = vld [vmem:[%s2419_s3 + $0x140] sm:$0xff] (!%p1331_p11)  ;;  %v1357_v48 = vld [vmem:[%s2419_s3 + $0x148] sm:$0xff] (!%p1331_p11)  ;;  %v807_v20 = vld [vmem:[%s2419_s3 + $0x10] sm:$0xff] (!%p1331_p11) }
  0x3b   : > { %1478 = vmatprep.subr.bf16.mxu0 %v1914_v19  ;;  %1496 = vmatprep.subr.bf16.mxu1 %v1914_v19  ;;  %v808_v21 = vld [vmem:[%s2419_s3 + $0x18] sm:$0xff] (!%p1331_p11) }
  0x3d   : > { %537 = vxpose.xlu0.c.b16.cont [4/8] (narrow) %v1800_v23, 16  ;;  %v1348_v23 = vld [vmem:[%s2419_s3 + $0x100] sm:$0xff] (!%p1331_p11) }
  0x3e   : > { %1479 = vmatpush3.bf16.msra.mxu0 %v1808_v28  ;;  %1497 = vmatpush3.bf16.msra.mxu1 %v1815_v49  ;;  %v1677_v26 = vpack.c.bf16 (!%p1331_p11), %v1349_v24, %v1348_v23  ;;  %v1350_v28 = vld [vmem:[%s2419_s3 + $0x110] sm:$0xff] (!%p1331_p11)  ;;  %v1920_v49 = vmov (!%p1331_p11), 0.0   ;;  %v1728_v23 = vpack.c.bf16 (!%p1331_p11), %v808_v21, %v807_v20  ;;  %v1368_v24 = vld [vmem:[%s2419_s3 + $0x1a0] sm:$0xff] (!%p1331_p11) }
  0x3f   : > { %1480 = vmatprep.subr.bf16.mxu0 %v1914_v19  ;;  %1498 = vmatprep.subr.bf16.mxu1 %v1914_v19 }
  0x41   : > { %538 = vxpose.xlu0.c.b16.cont [5/8] (narrow) %v1801_v25, 16  ;;  %v1334_v25 = vld [vmem:[%s2419_s3 + $0x90] sm:$0xff] (!%p1331_p11) }
  0x42   : > { %1481 = vmatpush3.bf16.msra.mxu0 %v1809_v30  ;;  %1499 = vmatpush3.bf16.msra.mxu1 %v1816_v50 }
  0x43   : > { %1482 = vmatprep.subr.bf16.mxu0 %v1914_v19  ;;  %1500 = vmatprep.subr.bf16.mxu1 %v1914_v19 }
  0x45   : > { %539 = vxpose.xlu0.c.b16.cont [6/8] (narrow) %v1802_v27, 16  ;;  %v1335_v27 = vld [vmem:[%s2419_s3 + $0x98] sm:$0xff] (!%p1331_p11) }
  0x46   : > { %1483 = vmatpush3.bf16.msra.mxu0 %v1810_v32  ;;  %1501 = vmatpush3.bf16.msra.mxu1 %v1817_v55  ;;  %v1656_v30 = vpack.c.bf16 (!%p1331_p11), %v1335_v27, %v1334_v25  ;;  %v1336_v32 = vld [vmem:[%s2419_s3 + $0xa0] sm:$0xff] (!%p1331_p11)  ;;  %v1359_v55 = vld [vmem:[%s2419_s3 + $0x158] sm:$0xff] (!%p1331_p11)  ;;  %v1369_v25 = vld [vmem:[%s2419_s3 + $0x1a8] sm:$0xff] (!%p1331_p11) }
  0x47   : > { %1484 = vmatprep.subr.bf16.mxu0 %v1914_v19  ;;  %1502 = vmatprep.subr.bf16.mxu1 %v1914_v19  ;;  %v810_v27 = vld [vmem:[%s2419_s3 + $0x28] sm:$0xff] (!%p1331_p11) }
  0x49   : > { %540 = vxpose.xlu0.c.b16.cont [7/8] (narrow) %v1803_v29, 16  ;;  %v1351_v29 = vld [vmem:[%s2419_s3 + $0x118] sm:$0xff] (!%p1331_p11) }
  0x4a   : > { %1485 = vmatpush3.bf16.msra.mxu0 %v1811_v33  ;;  %1503 = vmatpush3.bf16.msra.mxu1 %v1818_v57  ;;  %v1337_v33 = vld [vmem:[%s2419_s3 + $0xa8] sm:$0xff] (!%p1331_p11) }
  0x4b   : > { %1486 = vmatprep.subr.bf16.mxu0 %v1914_v19  ;;  %1504 = vmatprep.subr.bf16.mxu1 %v1914_v19  ;;  %v1659_v36 = vpack.c.bf16 (!%p1331_p11), %v1337_v33, %v1336_v32  ;;  %v811_v32 = vld [vmem:[%s2419_s3 + $0x30] sm:$0xff] (!%p1331_p11)  ;;  %v812_v33 = vld [vmem:[%s2419_s3 + $0x38] sm:$0xff] (!%p1331_p11) }
  0x4d   : > { %541 = vxpose.xlu0.c.b16.end [8/8] (narrow) %v1804_v31, 16  ;;  %v1680_v31 = vpack.c.bf16 (!%p1331_p11), %v1351_v29, %v1350_v28  ;;  %v1707_v28 = vpack.c.bf16 (!%p1331_p11), %v1369_v25, %v1368_v24 }
  0x4e   : > { %1487 = vmatpush3.bf16.msra.mxu0 %v1812_v34  ;;  %1505 = vmatpush3.bf16.msra.mxu1 %v1819_v58  ;;  %v1352_v34 = vld [vmem:[%s2419_s3 + $0x120] sm:$0xff] (!%p1331_p11) }
  0x4f   : > { %1506 = vmatprep.subr.bf16.mxu1 %v1914_v19  ;;  %v1918_v19 = vmov (!%p1331_p11), 0.0|0.0   ;;  %v1344_v58 = vld [vmem:[%s2419_s3 + $0xe0] sm:$0xff] (!%p1331_p11) }
  0x50   : > { %1652 = vmatprep.subr.bf16.mxu0 (!%p1331_p11), %v1918_v19 }
  0x52   : > { %1507 = vmatpush3.bf16.msra.mxu1 %v1820_v59  ;;  %v1345_v59 = vld [vmem:[%s2419_s3 + $0xe8] sm:$0xff] (!%p1331_p11) }
  0x53   : > { %1676 = vmatprep.subr.bf16.mxu1 (!%p1331_p11), %v1918_v19 }
  0x56   : > { %1796 = vset.pattern.permute.xlu0 %v1916_v46  ;;  %v1341_v46 = vld [vmem:[%s2419_s3 + $0xc8] sm:$0xff] (!%p1331_p11) }
  0x97   : > { %v542_v35 = vpop.trf.xlu0 }
  0x98   : > { %1489 = vmatmul.mubr.bf16.vlgmr.msra.gmra.mrb[0].mxu0 %v542_v35  ;;  %v1353_v35 = vld [vmem:[%s2419_s3 + $0x128] sm:$0xff] (!%p1331_p11) }
  0x99   : > { %1654 = vmatpush3.bf16.msra.mxu0 (!%p1331_p11), %v1653_v22  ;;  %v1683_v37 = vpack.c.bf16 (!%p1331_p11), %v1353_v35, %v1352_v34  ;;  %1544 = vmatprep.mubr.msk.f32.mxu0 (!%p1331_p11), %vm1919_vm5, %v1920_v49  ;;  %v1734_v35 = vpack.c.bf16 (!%p1331_p11), %v812_v33, %v811_v32 }
  0x9a   : > { %1655 = vmatprep.subr.bf16.mxu0 (!%p1331_p11), %v1918_v19 }
  0x9d   : > { %1657 = vmatpush3.bf16.msra.mxu0 (!%p1331_p11), %v1656_v30  ;;  %v1370_v30 = vld [vmem:[%s2419_s3 + $0x1b0] sm:$0xff] (!%p1331_p11) }
  0x9e   : > { %1658 = vmatprep.subr.bf16.mxu0 (!%p1331_p11), %v1918_v19 }
  0xa1   : > { %1660 = vmatpush3.bf16.msra.mxu0 (!%p1331_p11), %v1659_v36  ;;  %v1372_v36 = vld [vmem:[%s2419_s3 + $0x1c0] sm:$0xff] (!%p1331_p11) }
  0xa2   : > { %1661 = vmatprep.subr.bf16.mxu0 (!%p1331_p11), %v1918_v19 }
 0x16b   : > { %v632_v40 = vpop.f32.mrb[0].mxu0 }
 0x16c   : > { %v644_v41 = vsel %vm643_vm2, %v632_v40, -1e+30  ;;  %v1490_v42 = vpop.f32.mrb[1].mxu0  ;;  %v1354_v40 = vld [vmem:[%s2419_s3 + $0x130] sm:$0xff] (!%p1331_p11) }
 0x16d   : > { %645 = vst [vmem:[%s2041_s19] sm:$0xf] %v644_v41  ;;  %v635_v43 = vpop.f32.mrb[2].mxu0  ;;  %v648_v44 = vsel %vm647_vm3, %v644_v41, -inf }
 0x16e   : > { %649 = vmax.xlane.f32.xlu1 %v648_v44  ;;  %v1491_v45 = vpop.f32.mrb[3].mxu0  ;;  %v1662_v43 = vpack.c.bf16 (!%p1331_p11), %v1339_v39, %v1338_v38  ;;  %v813_v38 = vld [vmem:[%s2419_s3 + $0x40] sm:$0xff] (!%p1331_p11)  ;;  %v814_v39 = vld [vmem:[%s2419_s3 + $0x48] sm:$0xff] (!%p1331_p11) }
 0x16f   : > { %v1340_v45 = vld [vmem:[%s2419_s3 + $0xc0] sm:$0xff] (!%p1331_p11) }
 0x170   : > { %1663 = vmatpush3.bf16.msra.mxu0 (!%p1331_p11), %v1662_v43  ;;  %v1665_v50 = vpack.c.bf16 (!%p1331_p11), %v1341_v46, %v1340_v45  ;;  %v1375_v43 = vld [vmem:[%s2419_s3 + $0x1d8] sm:$0xff] (!%p1331_p11) }
 0x171   : > { %1664 = vmatprep.subr.bf16.mxu0 (!%p1331_p11), %v1918_v19  ;;  %v816_v45 = vld [vmem:[%s2419_s3 + $0x58] sm:$0xff] (!%p1331_p11) }
 0x174   : > { %1666 = vmatpush3.bf16.msra.mxu0 (!%p1331_p11), %v1665_v50  ;;  %v817_v50 = vld [vmem:[%s2419_s3 + $0x60] sm:$0xff] (!%p1331_p11) }
 0x175   : > { %1667 = vmatprep.subr.bf16.mxu0 (!%p1331_p11), %v1918_v19 }
 0x1fb   : > { %v650_v52 = vpop.xlane.xlu1 %649 }
 0x1fc   : > { %v651_v53 = vmax.f32 %v646_v51, %v650_v52  ;;  %v1342_v52 = vld [vmem:[%s2419_s3 + $0xd0] sm:$0xff] (!%p1331_p11) }
 0x1fe   : > { %v652_v54 = vsub.f32 %v646_v51, %v651_v53  ;;  %785 = vst.msk [vmem:[#allocation2] sm:$0xf] %vm669_vm4, %v651_v53  ;;  %657 = vperm.xlu1 %1795, %v651_v53   ;;  %v1689_v51 = vpack.c.bf16 (!%p1331_p11), %v1357_v48, %v1356_v47  ;;  %v1343_v53 = vld [vmem:[%s2419_s3 + $0xd8] sm:$0xff] (!%p1331_p11)  ;;  %v1376_v48 = vld [vmem:[%s2419_s3 + $0x1e0] sm:$0xff] (!%p1331_p11) }
 0x200   : > { %v653_v56 = vmul.f32 1.442695, %v652_v54  ;;  %v1358_v54 = vld [vmem:[%s2419_s3 + $0x150] sm:$0xff] (!%p1331_p11) }
 0x201   : > { %v1692_v57 = vpack.c.bf16 (!%p1331_p11), %v1359_v55, %v1358_v54  ;;  %v1378_v54 = vld [vmem:[%s2419_s3 + $0x1f0] sm:$0xff] (!%p1331_p11)  ;;  %v1379_v55 = vld [vmem:[%s2419_s3 + $0x1f8] sm:$0xff] (!%p1331_p11) }
 0x202   : > { %1821 = vpow2.f32 %v653_v56  ;;  %v1668_v56 = vpack.c.bf16 (!%p1331_p11), %v1343_v53, %v1342_v52 }
 0x204   : > { %1669 = vmatpush3.bf16.msra.mxu0 (!%p1331_p11), %v1668_v56  ;;  %v819_v56 = vld [vmem:[%s2419_s3 + $0x70] sm:$0xff] (!%p1331_p11) }
 0x205   : > { %v790_v16 = vld [vmem:[#allocation2] sm:$0xf] (!%p1331_p11)  ;;  %1670 = vmatprep.subr.bf16.mxu0 (!%p1331_p11), %v1918_v19 }
 0x206   : > { %791 = vst.msk [vmem:[%s2422_s6] sm:$0xf] (!%p1331_p11), %vm669_vm4, %v790_v16 }
 0x20c   : > { %v1822_v60 = vpop.eup %1821 }
 0x20d   : > { %674 = vperm.xlu0 %1796, %v1822_v60   ;;  %v664_v4 = vmul.f32 %v1822_v60, %v663_v3  ;;  %v1360_v60 = vld [vmem:[%s2419_s3 + $0x160] sm:$0xff] (!%p1331_p11)  ;;  %v1363_v3 = vld [vmem:[%s2419_s3 + $0x178] sm:$0xff] (!%p1331_p11) }
 0x211   : > { %1825 = vset.pattern.permute.xlu0 (!%p1331_p11), %v1917_v17 }
 0x27d   : > { %v658_v61 = vpop.permute.xlu1 %657 }
 0x27e   : > { %v660_v62 = vsub.f32 %v644_v41, %v658_v61  ;;  %v1355_v41 = vld [vmem:[%s2419_s3 + $0x138] sm:$0xff] (!%p1331_p11)  ;;  %v1361_v61 = vld [vmem:[%s2419_s3 + $0x168] sm:$0xff] (!%p1331_p11) }
 0x27f   : > { %v1686_v44 = vpack.c.bf16 (!%p1331_p11), %v1355_v41, %v1354_v40  ;;  %v1737_v41 = vpack.c.bf16 (!%p1331_p11), %v814_v39, %v813_v38 }
 0x280   : > { %v661_v63 = vmul.f32 1.442695, %v660_v62  ;;  %v1671_v62 = vpack.c.bf16 (!%p1331_p11), %v1345_v59, %v1344_v58  ;;  %v1722_v58 = vpack.c.bf16 (!%p1331_p11), %v1379_v55, %v1378_v54 }
 0x282   : > { %1823 = vpow2.f32 %v661_v63  ;;  %v1695_v63 = vpack.c.bf16 (!%p1331_p11), %v1361_v61, %v1360_v60  ;;  %1672 = vmatpush3.bf16.msra.mxu0 (!%p1331_p11), %v1671_v62 }
 0x283   : > { %1673 = vmatprep.subr.bf16.mxu0 (!%p1331_p11), %v1918_v19 }
 0x28c   : > { %v1824_v0 = vpop.eup %1823  ;;  %v675_v8 = vpop.permute.xlu0 %674 }
 0x28d   : > { %v665_v1 = vsel %vm647_vm3, %v1824_v0, 0.0  ;;  %v678_v2 = vpack.c.bf16 %v1824_v0, %v1824_v0  ;;  %v677_v9 = vmul.f32 %v675_v8, %v671_v7  ;;  %v1346_v0 = vld [vmem:[%s2419_s3 + $0xf0] sm:$0xff] (!%p1331_p11)  ;;  %v1364_v7 = vld [vmem:[%s2419_s3 + $0x180] sm:$0xff] (!%p1331_p11)  ;;  %v1365_v8 = vld [vmem:[%s2419_s3 + $0x188] sm:$0xff] (!%p1331_p11) }
 0x28e   : > { %666 = vadd.xlane.f32.xlu1 %v665_v1  ;;  %v1347_v1 = vld [vmem:[%s2419_s3 + $0xf8] sm:$0xff] (!%p1331_p11) }
 0x28f   : > { %1509 = vmatmul.mubr.bf16.vlgmr.msra.gmra.mrb[0].mxu1 %v678_v2  ;;  %v1362_v2 = vld [vmem:[%s2419_s3 + $0x170] sm:$0xff] (!%p1331_p11) }
 0x290   : > { %1678 = vmatpush3.bf16.msra.mxu1 (!%p1331_p11), %v1677_v26  ;;  %1579 = vmatprep.mubr.msk.f32.mxu1 (!%p1331_p11), %vm1919_vm5, %v1920_v49  ;;  %v809_v26 = vld [vmem:[%s2419_s3 + $0x20] sm:$0xff] (!%p1331_p11) }
 0x291   : > { %1679 = vmatprep.subr.bf16.mxu1 (!%p1331_p11), %v1918_v19  ;;  %v1731_v29 = vpack.c.bf16 (!%p1331_p11), %v810_v27, %v809_v26 }
 0x294   : > { %1681 = vmatpush3.bf16.msra.mxu1 (!%p1331_p11), %v1680_v31  ;;  %v1371_v31 = vld [vmem:[%s2419_s3 + $0x1b8] sm:$0xff] (!%p1331_p11) }
 0x295   : > { %1682 = vmatprep.subr.bf16.mxu1 (!%p1331_p11), %v1918_v19  ;;  %v1710_v34 = vpack.c.bf16 (!%p1331_p11), %v1371_v31, %v1370_v30 }
 0x298   : > { %1684 = vmatpush3.bf16.msra.mxu1 (!%p1331_p11), %v1683_v37  ;;  %v1373_v37 = vld [vmem:[%s2419_s3 + $0x1c8] sm:$0xff] (!%p1331_p11) }
 0x299   : > { %1685 = vmatprep.subr.bf16.mxu1 (!%p1331_p11), %v1918_v19  ;;  %v1713_v40 = vpack.c.bf16 (!%p1331_p11), %v1373_v37, %v1372_v36 }
 0x29c   : > { %1687 = vmatpush3.bf16.msra.mxu1 (!%p1331_p11), %v1686_v44  ;;  %v815_v44 = vld [vmem:[%s2419_s3 + $0x50] sm:$0xff] (!%p1331_p11) }
 0x29d   : > { %1688 = vmatprep.subr.bf16.mxu1 (!%p1331_p11), %v1918_v19  ;;  %v1740_v47 = vpack.c.bf16 (!%p1331_p11), %v816_v45, %v815_v44 }
 0x2a0   : > { %1690 = vmatpush3.bf16.msra.mxu1 (!%p1331_p11), %v1689_v51  ;;  %v818_v51 = vld [vmem:[%s2419_s3 + $0x68] sm:$0xff] (!%p1331_p11) }
 0x2a1   : > { %1691 = vmatprep.subr.bf16.mxu1 (!%p1331_p11), %v1918_v19  ;;  %v1743_v53 = vpack.c.bf16 (!%p1331_p11), %v818_v51, %v817_v50 }
 0x2a4   : > { %1693 = vmatpush3.bf16.msra.mxu1 (!%p1331_p11), %v1692_v57  ;;  %v820_v57 = vld [vmem:[%s2419_s3 + $0x78] sm:$0xff] (!%p1331_p11) }
 0x2a5   : > { %1694 = vmatprep.subr.bf16.mxu1 (!%p1331_p11), %v1918_v19  ;;  %v1746_v59 = vpack.c.bf16 (!%p1331_p11), %v820_v57, %v819_v56 }
 0x2a8   : > { %1696 = vmatpush3.bf16.msra.mxu1 (!%p1331_p11), %v1695_v63 }
 0x2a9   : > { %1697 = vmatprep.subr.bf16.mxu1 (!%p1331_p11), %v1918_v19 }
 0x31b   : > { %v667_v5 = vpop.xlane.xlu1 %666 }
 0x31c   : > { %v668_v6 = vadd.f32 %v667_v5, %v664_v4  ;;  %v1674_v4 = vpack.c.bf16 (!%p1331_p11), %v1347_v1, %v1346_v0  ;;  %v1698_v5 = vpack.c.bf16 (!%p1331_p11), %v1363_v3, %v1362_v2 }
 0x31e   : > { %670 = vst.msk [vmem:[#allocation3] sm:$0xf] %vm669_vm4, %v668_v6  ;;  %1675 = vmatpush3.bf16.msra.mxu0 (!%p1331_p11), %v1674_v4  ;;  %1699 = vmatpush3.bf16.msra.mxu1 (!%p1331_p11), %v1698_v5 }
 0x31f   : > { %1700 = vmatprep.subr.bf16.mxu0 (!%p1331_p11), %v1918_v19  ;;  %1724 = vmatprep.subr.bf16.mxu1 (!%p1331_p11), %v1918_v19 }
 0x325   : > { %v794_v15 = vld [vmem:[#allocation3] sm:$0xf] (!%p1331_p11) }
 0x326   : > { %1826 = vrcp.f32 (!%p1331_p11), %v794_v15  ;;  %v792_v18 = vld [vmem:[#allocation3] sm:$0xf] (!%p1331_p11)  ;;  %v1366_v15 = vld [vmem:[%s2419_s3 + $0x190] sm:$0xff] (!%p1331_p11) }
 0x327   : > { %793 = vst.msk [vmem:[%s2423_s7] sm:$0xf] (!%p1331_p11), %vm669_vm4, %v792_v18  ;;  %v1367_v18 = vld [vmem:[%s2419_s3 + $0x198] sm:$0xff] (!%p1331_p11) }
 0x328   : > { %v1704_v22 = vpack.c.bf16 (!%p1331_p11), %v1367_v18, %v1366_v15 }
 0x330   : > { %v1827_v42 = vpop.eup (!%p1331_p11), %1826 }
 0x331   : > { %800 = vperm.xlu0 (!%p1331_p11), %1825, %v1827_v42   ;;  %v1374_v42 = vld [vmem:[%s2419_s3 + $0x1d0] sm:$0xff] (!%p1331_p11) }
 0x332   : > { %v1716_v46 = vpack.c.bf16 (!%p1331_p11), %v1375_v43, %v1374_v42 }
 0x35f   : > { %789 = sbr.rel (%p1331_p11) target bundleno = 1202 (0x4b2), region = 89 }
 0x362   : > { %v777_v10 = vpop.f32.mrb[0].mxu1 }
 0x363   : > { %v783_v11 = vadd.f32 %v777_v10, %v677_v9  ;;  %v1510_v12 = vpop.f32.mrb[1].mxu1  ;;  %v805_v9 = vld [vmem:[%s2419_s3] sm:$0xff] (!%p1331_p11)  ;;  %v806_v10 = vld [vmem:[%s2419_s3 + $0x8] sm:$0xff] (!%p1331_p11) }
 0x364   : > { %v780_v13 = vpop.f32.mrb[2].mxu1 }
 0x365   : > { %784 = vst [vmem:[#allocation4] sm:$0xf] %v783_v11  ;;  %v1511_v14 = vpop.f32.mrb[3].mxu1  ;;  %v1701_v13 = vpack.c.bf16 (!%p1331_p11), %v1365_v8, %v1364_v7 }
 0x366   : > { %v1725_v14 = vpack.c.bf16 %v806_v10, %v805_v9 }
 0x36c   : > { %v797_v6 = vld [vmem:[#allocation4] sm:$0xf] }
 0x3b0   : > { %v801_v11 = vpop.permute.xlu0 %800 }
 0x3b1   : > { %v2249_v12 = vmul.f32 %v801_v11, %v797_v6 }
 0x3b3   : > { %804 = vst [vmem:[#allocation6] sm:$0xf] %v2249_v12  ;;  %v839_v16 = vrot.slane %v2249_v12, 1  ;;  %v928_v17 = vrot.slane %v2249_v12, 2  ;;  %v1017_v60 = vrot.slane %v2249_v12, 3 }
 0x3b5   : > { %1545 = vmatmul.mubr.f32.vlgmr.msra.gmra.mrb[0].mxu0 %v839_v16  ;;  %1580 = vmatmul.mubr.f32.vlgmr.msra.gmra.mrb[0].mxu1 %v928_v17 }
 0x3b6   : > { %1702 = vmatpush3.bf16.msra.mxu0 %v1701_v13  ;;  %1726 = vmatpush3.bf16.msra.mxu1 %v1725_v14 }
 0x3b7   : > { %1703 = vmatprep.subr.bf16.mxu0 %v1918_v19  ;;  %1727 = vmatprep.subr.bf16.mxu1 %v1918_v19 }
 0x3b8   : > { %1614 = vmatprep.mubr.msk.f32.mxu0 %vm1919_vm5, %v1920_v49  ;;  %1649 = vmatprep.mubr.msk.f32.mxu1 %vm1919_vm5, %v1920_v49  ;;  %v1377_v49 = vld [vmem:[%s2419_s3 + $0x1e8] sm:$0xff] }
 0x3b9   : > { %v1719_v52 = vpack.c.bf16 %v1377_v49, %v1376_v48 }
 0x3ba   : > { %1705 = vmatpush3.bf16.msra.mxu0 %v1704_v22  ;;  %1729 = vmatpush3.bf16.msra.mxu1 %v1728_v23 }
 0x3bb   : > { %1706 = vmatprep.subr.bf16.mxu0 %v1918_v19  ;;  %1730 = vmatprep.subr.bf16.mxu1 %v1918_v19 }
 0x3be   : > { %1708 = vmatpush3.bf16.msra.mxu0 %v1707_v28  ;;  %1732 = vmatpush3.bf16.msra.mxu1 %v1731_v29 }
 0x3bf   : > { %1709 = vmatprep.subr.bf16.mxu0 %v1918_v19  ;;  %1733 = vmatprep.subr.bf16.mxu1 %v1918_v19 }
 0x3c2   : > { %1711 = vmatpush3.bf16.msra.mxu0 %v1710_v34  ;;  %1735 = vmatpush3.bf16.msra.mxu1 %v1734_v35 }
 0x3c3   : > { %1712 = vmatprep.subr.bf16.mxu0 %v1918_v19  ;;  %1736 = vmatprep.subr.bf16.mxu1 %v1918_v19 }
 0x3c6   : > { %1714 = vmatpush3.bf16.msra.mxu0 %v1713_v40  ;;  %1738 = vmatpush3.bf16.msra.mxu1 %v1737_v41 }
 0x3c7   : > { %1715 = vmatprep.subr.bf16.mxu0 %v1918_v19  ;;  %1739 = vmatprep.subr.bf16.mxu1 %v1918_v19 }
 0x3ca   : > { %1717 = vmatpush3.bf16.msra.mxu0 %v1716_v46  ;;  %1741 = vmatpush3.bf16.msra.mxu1 %v1740_v47 }
 0x3cb   : > { %1718 = vmatprep.subr.bf16.mxu0 %v1918_v19  ;;  %1742 = vmatprep.subr.bf16.mxu1 %v1918_v19 }
 0x3ce   : > { %1720 = vmatpush3.bf16.msra.mxu0 %v1719_v52  ;;  %1744 = vmatpush3.bf16.msra.mxu1 %v1743_v53 }
 0x3cf   : > { %1721 = vmatprep.subr.bf16.mxu0 %v1918_v19  ;;  %1745 = vmatprep.subr.bf16.mxu1 %v1918_v19  ;;  %v1089_v19 = vld [vmem:[%s2420_s4] sm:$0x1] }
 0x3d2   : > { %1723 = vmatpush3.bf16.msra.mxu0 %v1722_v58  ;;  %1747 = vmatpush3.bf16.msra.mxu1 %v1746_v59 }
 0x3d5   : > { %1615 = vmatmul.mubr.f32.vlgmr.msra.gmra.mrb[2].mxu0 %v1017_v60  ;;  %1650 = vmatmul.mubr.f32.vlgmr.msra.gmra.mrb[2].mxu1 %v2249_v12 }
 0x488   : > { %v907_v61 = vpop.f32.mrb[0].mxu0  ;;  %v996_v62 = vpop.f32.mrb[0].mxu1 }
 0x489   : > { %v1546_v63 = vpop.f32.mrb[1].mxu0  ;;  %v1581_v0 = vpop.f32.mrb[1].mxu1 }
 0x4a8   : > { %v1085_v1 = vpop.f32.mrb[2].mxu0  ;;  %v1156_v2 = vpop.f32.mrb[2].mxu1 }
 0x4a9   : > { %v1157_v3 = vadd.f32 %v1156_v2, %v907_v61  ;;  %v1616_v4 = vpop.f32.mrb[3].mxu0  ;;  %v1651_v5 = vpop.f32.mrb[3].mxu1 }
 0x4ab   : > { %v1160_v6 = vadd.f32 %v1157_v3, %v996_v62 }
 0x4ad   : > { %v1161_v7 = vadd.f32 %v1160_v6, %v1085_v1 }
 0x4af   : > { %v1162_v8 = vadd.f32 %v1161_v7, %v1089_v19 }
 0x4b1   : > { %1164 = vst.msk [vmem:[#allocation8] sm:$0x1] %vm1163_vm6, %v1162_v8 }
 0x4b2 PF: > { %p1756_p12 = scmp.eq.s32.totalorder %s1989_s12, 2  ;;  %s1921_s21 = smov [#allocation6]  }
 0x4b3   : > { %s1185_s22 = sshll.u32 %s1921_s21, 4  ;;  %s1922_s15 = smov [#allocation8]   ;;  %s1186_s22 = int_to_ptr.vmem [resolvable:$true] %s1185_s22 }
 0x4b4   : > { %s1196_s19 = sshll.u32 %s1922_s15, 4  ;;  %s1828_s20 = scalar_lea.vmem %s1186_s22, 64  ;;  %s1197_s19 = int_to_ptr.vmem [resolvable:$true] %s1196_s19 }
 0x4b5   : > { %p1829_p13 = scmp.ne.s32.totalorder %s1186_s22, %s1828_s20  ;;  %p1835_p2 = scmp.lt.s32.totalorder %s1186_s22, %s1186_s22 }
 0x4b6   : > { %p1836_p3 = scmp.lt.s32.totalorder %s1828_s20, %s1828_s20 }
 0x4b7   : > { %p1830_p0 = pnand %p1829_p13, %p1756_p12 }
 0x4b8   : > { %p1837_p4 = por %p1836_p3, %p1835_p2 }
 0x4b9   : > { %p1831_p1 = pneg %p1830_p0 }
 0x4bb   : > { %p1838_p5 = pnand %p1837_p4, %p1831_p1 }
 0x4bd   : > { %1841 = shalt.err (!%p1838_p5)
}
 0x4be   : > { %s1842_s25 = scalar_lea.hbm %s2424_s8, 64 }
 0x4bf   : > { %p1843_p6 = scmp.ne.s32.totalorder %s2424_s8, %s1842_s25  ;;  %p1848_p9 = scmp.lt.u32.totalorder %s1842_s25, %s2424_s8 }
 0x4c1   : > { %p1844_p7 = pnand %p1843_p6, %p1756_p12 }
 0x4c3   : > { %p1845_p8 = pneg %p1844_p7 }
 0x4c5   : > { %p1850_p10 = pnand %p1848_p9, %p1845_p8 }
 0x4c7   : > { %1853 = shalt.err (!%p1850_p10)
}
 0x4c8   : > { %1749 = dma.vmem_to_hbm [thread:$0]  (%p1756_p12), %s1186_s22, 64, %s2424_s8, [#allocation7]  }
 0x4c9   : > { %s1854_s17 = scalar_lea.vmem %s1197_s19, 16  ;;  %s1860_s18 = scalar_lea.vmem %s1197_s19, 32 }
 0x4ca   : > { %p1855_p11 = scmp.ne.s32.totalorder %s1197_s19, %s1854_s17  ;;  %p1861_p1 = scmp.lt.s32.totalorder %s1197_s19, %s1197_s19 }
 0x4cb   : > { %p1862_p2 = scmp.lt.s32.totalorder %s1860_s18, %s1854_s17 }
 0x4cc   : > { %p1856_p13 = pnand %p1855_p11, %p1756_p12 }
 0x4cd   : > { %p1863_p3 = por %p1862_p2, %p1861_p1 }
 0x4ce   : > { %p1857_p0 = pneg %p1856_p13 }
 0x4d0   : > { %p1864_p4 = pnand %p1863_p3, %p1857_p0 }
 0x4d2   : > { %1867 = shalt.err (!%p1864_p4)
}
 0x4d3   : > { %s1868_s15 = scalar_lea.hbm %s2425_s9, 16 }
 0x4d4   : > { %p1869_p5 = scmp.ne.s32.totalorder %s2425_s9, %s1868_s15  ;;  %p1874_p8 = scmp.lt.u32.totalorder %s1868_s15, %s2425_s9 }
 0x4d6   : > { %p1870_p6 = pnand %p1869_p5, %p1756_p12 }
 0x4d8   : > { %p1871_p7 = pneg %p1870_p6 }
 0x4da   : > { %p1876_p9 = pnand %p1874_p8, %p1871_p7 }
 0x4dc   : > { %1879 = shalt.err (!%p1876_p9)
}
 0x4dd   : > { %1751 = dma.vmem_to_hbm [thread:$0]  (%p1756_p12), %s1197_s19, 16, %s2425_s9, [#allocation9]  }
 0x4de   : > { %1893 = dma.done.wait (%p1756_p12), [#allocation7], 64  }
 0x4df   : > { %1895 = vsyncadd (%p1756_p12), [#allocation7], 4294967232 }
 0x4e0   : > { %1897 = dma.done.wait (%p1756_p12), [#allocation9], 16  }
 0x4e1   : > { %1899 = vsyncadd (%p1756_p12), [#allocation9], 4294967280 }
 0x4e2 PF: > { %p19_p10 = scmp.ge.s32.totalorder %s1992_s13, 5   ;;  %s2426_s30 = smov %s1906_s10 }
 0x4e3   : > { %s2427_s10 = smov %s2001_s16  ;;  %s2428_s11 = smov %s1992_s13 }
 0x4e4   :  { %21 = sbr.rel (!%p19_p10) target bundleno = 3 (0x3), region = 163 }
 0x4eb   :  { %1226 = vsyncpa [#allocation7], 1 }
 0x4ec   :  { %1228 = vsyncpa [#allocation7 + $0x1], 1 }
 0x4ed   :  { %1229 = vsyncpa [#allocation9], 1 }

</bundles_post_ra>
